<compile_context>
chip_gen: v5e
topology: v5e:2x2
jax: 0.10.0
libtpu: 0.0.40
codegen_flags: <defaults>
</compile_context>

<pallas_src>
import numpy as np
import jax
import jax.numpy as jnp
from jax import lax
from jax.experimental import pallas as pl
from jax.experimental.pallas import tpu as pltpu


def _make_mhsa_kernel(num_heads, latent_dim, batch_block, seq_len, embed_dim, has_mask):
    H, D = num_heads, latent_dim
    HD = H * D
    Bt, N, E = batch_block, seq_len, embed_dim

    def mhsa_kernel(*refs):
        if has_mask:
            x_ref, m_ref, wqkv_ref, wo_ref, o_ref, attn_slab = refs
        else:
            x_ref, wqkv_ref, wo_ref, o_ref, attn_slab = refs

        # ---- Fused QKV projection: one lane-dense MXU matmul over all batches & heads.
        # (1/sqrt(D) already folded into the w_q slab on the wrapper side.)
        x_flat = x_ref[...].reshape(Bt * N, E)                          # bf16
        qkv = jnp.dot(x_flat, wqkv_ref[...],
                      preferred_element_type=jnp.float32)               # [Bt*N, 3HD] f32
        # Single bf16 cast of the whole slab (instead of 3*H per-head casts).
        qkv = qkv.astype(jnp.bfloat16).reshape(Bt, N, 3 * HD)

        if has_mask:
            # Hoisted compare: one bool tile reused by every head.
            keep = m_ref[...] != 0                                       # [Bt, N, N] bool

        for h in range(H):                         # H is small & static: unrolled
            q = qkv[:, :, h * D:(h + 1) * D]                             # [Bt, N, D] bf16
            k = qkv[:, :, HD + h * D:HD + (h + 1) * D]
            v = qkv[:, :, 2 * HD + h * D:2 * HD + (h + 1) * D]

            # score = q @ k^T per batch (contract last dims; no XLU transpose).
            s = jnp.einsum('bqd,bkd->bqk', q, k,
                           preferred_element_type=jnp.float32)           # [Bt, N, N] f32
            if has_mask:
                # Equivalent to score*m + (-1e8)*(1-m) for binary masks.
                s = jnp.where(keep, s, -100000000.0)

            # Numerically-stable softmax; exp kept in f32 (portable incl. v5e EUP).
            s = s - jnp.max(s, axis=-1, keepdims=True)
            p = jnp.exp(s)
            l = jnp.sum(p, axis=-1, keepdims=True)                       # [Bt, N, 1]

            # Normalize AFTER the matmul: O(N*D) scale instead of O(N^2).
            attn = jnp.einsum('bqk,bkd->bqd', p.astype(jnp.bfloat16), v,
                              preferred_element_type=jnp.float32)        # [Bt, N, D] f32
            attn = attn * pl.reciprocal(l, approx=True)
            attn_slab[:, :, h * D:(h + 1) * D] = attn.astype(jnp.bfloat16)

        # ---- Fused output projection across all heads/batches: one matmul, one store.
        attn_all = attn_slab[...].reshape(Bt * N, HD)                    # bf16
        out = jnp.dot(attn_all, wo_ref[...],
                      preferred_element_type=jnp.float32)                # [Bt*N, E] f32
        o_ref[...] = out.reshape(Bt, N, E)

    return mhsa_kernel


def prepare_mhsa_weights(w_q, w_k, w_v, w_o):
    """One-time weight prep (hoist out of the per-call path / cache under jit).

    Concats per-head weights into lane-dense slabs, folds 1/sqrt(D) into w_q, casts bf16.
    """
    H, E, D = w_q.shape
    HD = H * D
    inv_sqrt_d = 1.0 / np.sqrt(D)
    wq = jnp.transpose(w_q, (1, 0, 2)).reshape(E, HD) * inv_sqrt_d
    wk = jnp.transpose(w_k, (1, 0, 2)).reshape(E, HD)
    wv = jnp.transpose(w_v, (1, 0, 2)).reshape(E, HD)
    w_qkv = jnp.concatenate([wq, wk, wv], axis=1).astype(jnp.bfloat16)   # [E, 3*H*D]
    w_o_flat = w_o.reshape(HD, E).astype(jnp.bfloat16)                   # [H*D, E]
    return w_qkv, w_o_flat


def _pick_batch_block(batch, seq_len, target_rows=256):
    """Pick Bt so Bt*N ~ target MXU M-dim, with B % Bt == 0."""
    bt = max(1, min(batch, target_rows // max(seq_len, 1)))
    while batch % bt:
        bt -= 1
    return bt


def mhsa_forward(x, w_qkv, w_o_flat, num_heads, latent_dim, mask=None, *, batch_block=None):
    """x: [B, N, E] f32; w_qkv: [E, 3*H*D] bf16; w_o_flat: [H*D, E] bf16; mask: [B, N, N] binary or None."""
    B, N, E = x.shape
    H, D = num_heads, latent_dim
    HD = H * D
    has_mask = mask is not None

    Bt = batch_block if batch_block is not None else _pick_batch_block(B, N)
    assert B % Bt == 0

    x_bf = x.astype(jnp.bfloat16)                 # halve the x DMA bytes
    kernel = _make_mhsa_kernel(H, D, Bt, N, E, has_mask)

    def weight_spec(shape, pipeline_mode):
        if pipeline_mode is None:
            return pl.BlockSpec(shape, lambda b: (0, 0))
        return pl.BlockSpec(shape, lambda b: (0, 0), pipeline_mode=pipeline_mode)

    def build_call(weight_pipeline_mode):
        in_specs = [pl.BlockSpec((Bt, N, E), lambda b: (b, 0, 0))]       # x
        if has_mask:
            in_specs.append(pl.BlockSpec((Bt, N, N), lambda b: (b, 0, 0)))  # mask (bf16)
        in_specs += [
            weight_spec((E, 3 * HD), weight_pipeline_mode),              # fused w_qkv
            weight_spec((HD, E), weight_pipeline_mode),                  # fused w_o
        ]
        grid_spec = pltpu.PrefetchScalarGridSpec(
            num_scalar_prefetch=0,
            grid=(B // Bt,),
            in_specs=in_specs,
            out_specs=pl.BlockSpec((Bt, N, E), lambda b: (b, 0, 0)),
            scratch_shapes=[pltpu.VMEM((Bt, N, HD), jnp.bfloat16)],      # per-head output slab
        )
        return pl.pallas_call(
            kernel,
            out_shape=jax.ShapeDtypeStruct((B, N, E), jnp.float32),
            grid_spec=grid_spec,
            compiler_params=pltpu.CompilerParams(
                dimension_semantics=("parallel",),
                # Above the 16/32 MiB scoped defaults, below v7x's 64 MiB physical.
                vmem_limit_bytes=48 * 1024 * 1024),
        )

    args = [x_bf]
    if has_mask:
        args.append(mask.astype(jnp.bfloat16))    # binary mask: bf16 is exact, 2x fewer bytes
    args += [w_qkv, w_o_flat]

    try:
        # Grid-invariant weights: single-buffer them (no useless double-buffer copies).
        return build_call(pl.Buffered(1))(*args)
    except Exception:
        # Fallback: stacks where per-BlockSpec pipeline_mode is not honored by pallas_call.
        return build_call(None)(*args)


def multi_head_self_attention(x, w_q, w_k, w_v, w_o, mask=None, *, batch_block=None):
    """Convenience wrapper; for repeated calls, hoist prepare_mhsa_weights() and use mhsa_forward()."""
    H, _, D = w_q.shape
    w_qkv, w_o_flat = prepare_mhsa_weights(w_q, w_k, w_v, w_o)
    return mhsa_forward(x, w_qkv, w_o_flat, H, D, mask, batch_block=batch_block)


# ---------------------------------------------------------------------------
# References for verification.
# ---------------------------------------------------------------------------
def _reference_f32(x, w_q, w_k, w_v, w_o, mask=None):
    """Exact f32 port of the PyTorch module forward (dropout = Identity)."""
    D = w_q.shape[-1]
    q = jnp.einsum('blj,njd->bnld', x, w_q)
    k = jnp.einsum('blj,njd->bnld', x, w_k)
    v = jnp.einsum('blj,njd->bnld', x, w_v)
    score = jnp.einsum('bnij,bnkj->bnik', q, k) / np.sqrt(D)
    if mask is not None:
        m = mask[:, None]
        score = score * m + (-100000000.0) * (1 - m)
    score = jax.nn.softmax(score, axis=-1)
    out = jnp.einsum('bnij,bnjk->bnik', score, v)
    return jnp.einsum('bnlj,njk->blk', out, w_o)


def _reference_matched(x, w_q, w_k, w_v, w_o, mask=None):
    """Mirror of the kernel's bf16-input / f32-accumulate math (exact softmax divide)."""
    B, N, E = x.shape
    H, _, D = w_q.shape
    HD = H * D
    w_qkv, w_o_flat = prepare_mhsa_weights(w_q, w_k, w_v, w_o)
    xb = x.astype(jnp.bfloat16)
    qkv = jnp.einsum('bne,ef->bnf', xb, w_qkv,
                     preferred_element_type=jnp.float32).astype(jnp.bfloat16)
    if mask is not None:
        keep = mask.astype(jnp.bfloat16) != 0
    heads = []
    for h in range(H):
        q = qkv[..., h * D:(h + 1) * D]
        k = qkv[..., HD + h * D:HD + (h + 1) * D]
        v = qkv[..., 2 * HD + h * D:2 * HD + (h + 1) * D]
        s = jnp.einsum('bid,bjd->bij', q, k, preferred_element_type=jnp.float32)
        if mask is not None:
            s = jnp.where(keep, s, -100000000.0)
        s = s - jnp.max(s, axis=-1, keepdims=True)
        p = jnp.exp(s)
        l = jnp.sum(p, axis=-1, keepdims=True)
        attn = jnp.einsum('bij,bjd->bid', p.astype(jnp.bfloat16), v,
                          preferred_element_type=jnp.float32) / l
        heads.append(attn.astype(jnp.bfloat16))
    attn_all = jnp.concatenate(heads, axis=-1)
    return jnp.einsum('bnh,he->bne', attn_all, w_o_flat,
                      preferred_element_type=jnp.float32)


if __name__ == "__main__":
    # Small, module-consistent shapes.
    B, N, E = 2, 8, 32        # batch, seq length, embed_dim
    H, D = 4, 16              # num_heads, latent_dim

    key = jax.random.PRNGKey(0)
    kx, kq, kk, kv, ko, km = jax.random.split(key, 6)

    x = jax.random.normal(kx, (B, N, E), dtype=jnp.float32)

    # Deterministic xavier-normal-like init (std = sqrt(2 / (fan_in + fan_out))).
    std_in = np.sqrt(2.0 / (E * D + H * D))
    std_out = np.sqrt(2.0 / (H * E + D * E))
    w_q = std_in * jax.random.normal(kq, (H, E, D), dtype=jnp.float32)
    w_k = std_in * jax.random.normal(kk, (H, E, D), dtype=jnp.float32)
    w_v = std_in * jax.random.normal(kv, (H, E, D), dtype=jnp.float32)
    w_o = std_out * jax.random.normal(ko, (H, D, E), dtype=jnp.float32)

    # Binary mask [B, N, N] (the module uses 0/1 masks).
    mask = (jax.random.uniform(km, (B, N, N)) > 0.2).astype(jnp.float32)

    # One-time weight prep (hoisted out of the per-call path).
    w_qkv, w_o_flat = prepare_mhsa_weights(w_q, w_k, w_v, w_o)

    # Masked path.
    out = jax.block_until_ready(mhsa_forward(x, w_qkv, w_o_flat, H, D, mask))
    ref_m = _reference_matched(x, w_q, w_k, w_v, w_o, mask)
    ref_f = _reference_f32(x, w_q, w_k, w_v, w_o, mask)
    np.testing.assert_allclose(np.asarray(out), np.asarray(ref_m), rtol=5e-3, atol=5e-3)
    np.testing.assert_allclose(np.asarray(out), np.asarray(ref_f), rtol=2e-2, atol=1e-2)

    # mask=None path (no mask input, no masking math in the kernel).
    out_nm = jax.block_until_ready(mhsa_forward(x, w_qkv, w_o_flat, H, D, None))
    ref_m_nm = _reference_matched(x, w_q, w_k, w_v, w_o, None)
    ref_f_nm = _reference_f32(x, w_q, w_k, w_v, w_o, None)
    np.testing.assert_allclose(np.asarray(out_nm), np.asarray(ref_m_nm), rtol=5e-3, atol=5e-3)
    np.testing.assert_allclose(np.asarray(out_nm), np.asarray(ref_f_nm), rtol=2e-2, atol=1e-2)

    # Convenience wrapper (raw-weight API) still works.
    out_w = jax.block_until_ready(multi_head_self_attention(x, w_q, w_k, w_v, w_o, mask))
    np.testing.assert_allclose(np.asarray(out_w), np.asarray(out), rtol=1e-6, atol=1e-6)

    print("KERNEL_OK")
</pallas_src>

<mosaic_0001>
module attributes {stable_mosaic.version = 11 : i64} {
  func.func @mhsa_kernel(%arg0: i32, %arg1: memref<2x8x32xbf16, #tpu.memory_space<vmem>>, %arg2: memref<2x8x8xbf16, #tpu.memory_space<vmem>>, %arg3: memref<32x192xbf16, #tpu.memory_space<vmem>>, %arg4: memref<64x32xbf16, #tpu.memory_space<vmem>>, %arg5: memref<2x8x32xf32, #tpu.memory_space<vmem>>, %arg6: memref<2x8x64xbf16, #tpu.memory_space<vmem>>) attributes {dimension_semantics = [#tpu.dimension_semantics<parallel>], iteration_bounds = array<i64: 1>, scalar_prefetch = 0 : i64, scratch_operands = 1 : i64, tpu.core_type = #tpu.core_type<tc>, window_params = [{transform_indices = @transform_0, window_bounds = array<i64: 2, 8, 32>}, {transform_indices = @transform_1, window_bounds = array<i64: 2, 8, 8>}, {pipeline_mode = #tpu.pipeline_mode<synchronous>, transform_indices = @transform_2, window_bounds = array<i64: 32, 192>}, {pipeline_mode = #tpu.pipeline_mode<synchronous>, transform_indices = @transform_3, window_bounds = array<i64: 64, 32>}, {transform_indices = @transform_4, window_bounds = array<i64: 2, 8, 32>}]} {
    %c0 = arith.constant 0 : index
    %c0_0 = arith.constant 0 : index
    %c0_1 = arith.constant 0 : index
    %0 = vector.load %arg1[%c0, %c0_0, %c0_1] : memref<2x8x32xbf16, #tpu.memory_space<vmem>>, vector<2x8x32xbf16>
    %1 = vector.shape_cast %0 : vector<2x8x32xbf16> to vector<16x32xbf16>
    %c0_2 = arith.constant 0 : index
    %c0_3 = arith.constant 0 : index
    %2 = vector.load %arg3[%c0_2, %c0_3] : memref<32x192xbf16, #tpu.memory_space<vmem>>, vector<32x192xbf16>
    %cst = arith.constant dense<0.000000e+00> : vector<16x192xf32>
    %3 = tpu.matmul %1, %2, %cst {dimension_numbers = #tpu.dot_dimension_numbers<[1], [0], [0], [1], [0, 0, 1, 1], [], []>} : vector<16x32xbf16>, vector<32x192xbf16>, vector<16x192xf32> -> vector<16x192xf32>
    %4 = arith.truncf %3 : vector<16x192xf32> to vector<16x192xbf16>
    %5 = vector.shape_cast %4 : vector<16x192xbf16> to vector<2x8x192xbf16>
    %c0_4 = arith.constant 0 : index
    %c0_5 = arith.constant 0 : index
    %c0_6 = arith.constant 0 : index
    %6 = vector.load %arg2[%c0_4, %c0_5, %c0_6] : memref<2x8x8xbf16, #tpu.memory_space<vmem>>, vector<2x8x8xbf16>
    %cst_7 = arith.constant 0.000000e+00 : bf16
    %7 = vector.broadcast %cst_7 : bf16 to vector<2x8x8xbf16>
    %8 = arith.cmpf one, %6, %7 : vector<2x8x8xbf16>
    %9 = vector.extract_strided_slice %5 {offsets = [0, 0, 0], sizes = [2, 8, 16], strides = [1, 1, 1]} : vector<2x8x192xbf16> to vector<2x8x16xbf16>
    %10 = vector.extract_strided_slice %5 {offsets = [0, 0, 64], sizes = [2, 8, 16], strides = [1, 1, 1]} : vector<2x8x192xbf16> to vector<2x8x16xbf16>
    %11 = vector.extract_strided_slice %5 {offsets = [0, 0, 128], sizes = [2, 8, 16], strides = [1, 1, 1]} : vector<2x8x192xbf16> to vector<2x8x16xbf16>
    "tpu.trace_start"() <{level = 10 : i32, message = "bqd,bkd->bqk"}> : () -> ()
    %cst_8 = arith.constant dense<0.000000e+00> : vector<2x8x8xf32>
    %12 = tpu.matmul %9, %10, %cst_8 {dimension_numbers = #tpu.dot_dimension_numbers<[2], [2], [1], [1], [0, 0, 0, 1, 1, 1], [0], [0]>} : vector<2x8x16xbf16>, vector<2x8x16xbf16>, vector<2x8x8xf32> -> vector<2x8x8xf32>
    %cst_9 = arith.constant -1.000000e+08 : f32
    "tpu.trace_stop"() : () -> ()
    %13 = vector.broadcast %cst_9 : f32 to vector<2x8x8xf32>
    %14 = arith.select %8, %12, %13 : vector<2x8x8xi1>, vector<2x8x8xf32>
    %cst_10 = arith.constant dense<0xFF800000> : vector<2x8xf32>
    %15 = vector.multi_reduction <maximumf>, %14, %cst_10 [2] : vector<2x8x8xf32> to vector<2x8xf32>
    %16 = vector.shape_cast %15 : vector<2x8xf32> to vector<2x8x1xf32>
    %17 = vector.broadcast %16 : vector<2x8x1xf32> to vector<2x8x8xf32>
    %18 = arith.subf %14, %17 : vector<2x8x8xf32>
    %19 = math.exp %18 : vector<2x8x8xf32>
    %cst_11 = arith.constant dense<0.000000e+00> : vector<2x8xf32>
    %20 = vector.multi_reduction <add>, %19, %cst_11 [2] : vector<2x8x8xf32> to vector<2x8xf32>
    %21 = vector.shape_cast %20 : vector<2x8xf32> to vector<2x8x1xf32>
    %22 = arith.truncf %19 : vector<2x8x8xf32> to vector<2x8x8xbf16>
    "tpu.trace_start"() <{level = 10 : i32, message = "bqk,bkd->bqd"}> : () -> ()
    %cst_12 = arith.constant dense<0.000000e+00> : vector<2x8x16xf32>
    %23 = tpu.matmul %22, %11, %cst_12 {dimension_numbers = #tpu.dot_dimension_numbers<[2], [1], [1], [2], [0, 0, 0, 1, 1, 2], [0], [0]>} : vector<2x8x8xbf16>, vector<2x8x16xbf16>, vector<2x8x16xf32> -> vector<2x8x16xf32>
    "tpu.trace_stop"() : () -> ()
    %24 = tpu.reciprocal %21 {approx = true} : vector<2x8x1xf32> -> vector<2x8x1xf32>
    %25 = vector.broadcast %24 : vector<2x8x1xf32> to vector<2x8x16xf32>
    %26 = arith.mulf %23, %25 : vector<2x8x16xf32>
    %27 = arith.truncf %26 : vector<2x8x16xf32> to vector<2x8x16xbf16>
    %c0_13 = arith.constant 0 : index
    %c0_14 = arith.constant 0 : index
    %c0_15 = arith.constant 0 : index
    %28 = vector.load %arg6[%c0_13, %c0_14, %c0_15] : memref<2x8x64xbf16, #tpu.memory_space<vmem>>, vector<2x8x16xbf16>
    tpu.vector_store %arg6[%c0_13, %c0_14, %c0_15], %27 {strides = array<i32>} : memref<2x8x64xbf16, #tpu.memory_space<vmem>>, vector<2x8x16xbf16>,
    %29 = vector.extract_strided_slice %5 {offsets = [0, 0, 16], sizes = [2, 8, 16], strides = [1, 1, 1]} : vector<2x8x192xbf16> to vector<2x8x16xbf16>
    %30 = vector.extract_strided_slice %5 {offsets = [0, 0, 80], sizes = [2, 8, 16], strides = [1, 1, 1]} : vector<2x8x192xbf16> to vector<2x8x16xbf16>
    %31 = vector.extract_strided_slice %5 {offsets = [0, 0, 144], sizes = [2, 8, 16], strides = [1, 1, 1]} : vector<2x8x192xbf16> to vector<2x8x16xbf16>
    "tpu.trace_start"() <{level = 10 : i32, message = "bqd,bkd->bqk"}> : () -> ()
    %cst_16 = arith.constant dense<0.000000e+00> : vector<2x8x8xf32>
    %32 = tpu.matmul %29, %30, %cst_16 {dimension_numbers = #tpu.dot_dimension_numbers<[2], [2], [1], [1], [0, 0, 0, 1, 1, 1], [0], [0]>} : vector<2x8x16xbf16>, vector<2x8x16xbf16>, vector<2x8x8xf32> -> vector<2x8x8xf32>
    %cst_17 = arith.constant -1.000000e+08 : f32
    "tpu.trace_stop"() : () -> ()
    %33 = vector.broadcast %cst_17 : f32 to vector<2x8x8xf32>
    %34 = arith.select %8, %32, %33 : vector<2x8x8xi1>, vector<2x8x8xf32>
    %cst_18 = arith.constant dense<0xFF800000> : vector<2x8xf32>
    %35 = vector.multi_reduction <maximumf>, %34, %cst_18 [2] : vector<2x8x8xf32> to vector<2x8xf32>
    %36 = vector.shape_cast %35 : vector<2x8xf32> to vector<2x8x1xf32>
    %37 = vector.broadcast %36 : vector<2x8x1xf32> to vector<2x8x8xf32>
    %38 = arith.subf %34, %37 : vector<2x8x8xf32>
    %39 = math.exp %38 : vector<2x8x8xf32>
    %cst_19 = arith.constant dense<0.000000e+00> : vector<2x8xf32>
    %40 = vector.multi_reduction <add>, %39, %cst_19 [2] : vector<2x8x8xf32> to vector<2x8xf32>
    %41 = vector.shape_cast %40 : vector<2x8xf32> to vector<2x8x1xf32>
    %42 = arith.truncf %39 : vector<2x8x8xf32> to vector<2x8x8xbf16>
    "tpu.trace_start"() <{level = 10 : i32, message = "bqk,bkd->bqd"}> : () -> ()
    %cst_20 = arith.constant dense<0.000000e+00> : vector<2x8x16xf32>
    %43 = tpu.matmul %42, %31, %cst_20 {dimension_numbers = #tpu.dot_dimension_numbers<[2], [1], [1], [2], [0, 0, 0, 1, 1, 2], [0], [0]>} : vector<2x8x8xbf16>, vector<2x8x16xbf16>, vector<2x8x16xf32> -> vector<2x8x16xf32>
    "tpu.trace_stop"() : () -> ()
    %44 = tpu.reciprocal %41 {approx = true} : vector<2x8x1xf32> -> vector<2x8x1xf32>
    %45 = vector.broadcast %44 : vector<2x8x1xf32> to vector<2x8x16xf32>
    %46 = arith.mulf %43, %45 : vector<2x8x16xf32>
    %47 = arith.truncf %46 : vector<2x8x16xf32> to vector<2x8x16xbf16>
    %c0_21 = arith.constant 0 : index
    %c0_22 = arith.constant 0 : index
    %c16 = arith.constant 16 : index
    %48 = vector.load %arg6[%c0_21, %c0_22, %c16] : memref<2x8x64xbf16, #tpu.memory_space<vmem>>, vector<2x8x16xbf16>
    tpu.vector_store %arg6[%c0_21, %c0_22, %c16], %47 {strides = array<i32>} : memref<2x8x64xbf16, #tpu.memory_space<vmem>>, vector<2x8x16xbf16>,
    %49 = vector.extract_strided_slice %5 {offsets = [0, 0, 32], sizes = [2, 8, 16], strides = [1, 1, 1]} : vector<2x8x192xbf16> to vector<2x8x16xbf16>
    %50 = vector.extract_strided_slice %5 {offsets = [0, 0, 96], sizes = [2, 8, 16], strides = [1, 1, 1]} : vector<2x8x192xbf16> to vector<2x8x16xbf16>
    %51 = vector.extract_strided_slice %5 {offsets = [0, 0, 160], sizes = [2, 8, 16], strides = [1, 1, 1]} : vector<2x8x192xbf16> to vector<2x8x16xbf16>
    "tpu.trace_start"() <{level = 10 : i32, message = "bqd,bkd->bqk"}> : () -> ()
    %cst_23 = arith.constant dense<0.000000e+00> : vector<2x8x8xf32>
    %52 = tpu.matmul %49, %50, %cst_23 {dimension_numbers = #tpu.dot_dimension_numbers<[2], [2], [1], [1], [0, 0, 0, 1, 1, 1], [0], [0]>} : vector<2x8x16xbf16>, vector<2x8x16xbf16>, vector<2x8x8xf32> -> vector<2x8x8xf32>
    %cst_24 = arith.constant -1.000000e+08 : f32
    "tpu.trace_stop"() : () -> ()
    %53 = vector.broadcast %cst_24 : f32 to vector<2x8x8xf32>
    %54 = arith.select %8, %52, %53 : vector<2x8x8xi1>, vector<2x8x8xf32>
    %cst_25 = arith.constant dense<0xFF800000> : vector<2x8xf32>
    %55 = vector.multi_reduction <maximumf>, %54, %cst_25 [2] : vector<2x8x8xf32> to vector<2x8xf32>
    %56 = vector.shape_cast %55 : vector<2x8xf32> to vector<2x8x1xf32>
    %57 = vector.broadcast %56 : vector<2x8x1xf32> to vector<2x8x8xf32>
    %58 = arith.subf %54, %57 : vector<2x8x8xf32>
    %59 = math.exp %58 : vector<2x8x8xf32>
    %cst_26 = arith.constant dense<0.000000e+00> : vector<2x8xf32>
    %60 = vector.multi_reduction <add>, %59, %cst_26 [2] : vector<2x8x8xf32> to vector<2x8xf32>
    %61 = vector.shape_cast %60 : vector<2x8xf32> to vector<2x8x1xf32>
    %62 = arith.truncf %59 : vector<2x8x8xf32> to vector<2x8x8xbf16>
    "tpu.trace_start"() <{level = 10 : i32, message = "bqk,bkd->bqd"}> : () -> ()
    %cst_27 = arith.constant dense<0.000000e+00> : vector<2x8x16xf32>
    %63 = tpu.matmul %62, %51, %cst_27 {dimension_numbers = #tpu.dot_dimension_numbers<[2], [1], [1], [2], [0, 0, 0, 1, 1, 2], [0], [0]>} : vector<2x8x8xbf16>, vector<2x8x16xbf16>, vector<2x8x16xf32> -> vector<2x8x16xf32>
    "tpu.trace_stop"() : () -> ()
    %64 = tpu.reciprocal %61 {approx = true} : vector<2x8x1xf32> -> vector<2x8x1xf32>
    %65 = vector.broadcast %64 : vector<2x8x1xf32> to vector<2x8x16xf32>
    %66 = arith.mulf %63, %65 : vector<2x8x16xf32>
    %67 = arith.truncf %66 : vector<2x8x16xf32> to vector<2x8x16xbf16>
    %c0_28 = arith.constant 0 : index
    %c0_29 = arith.constant 0 : index
    %c32 = arith.constant 32 : index
    %68 = vector.load %arg6[%c0_28, %c0_29, %c32] : memref<2x8x64xbf16, #tpu.memory_space<vmem>>, vector<2x8x16xbf16>
    tpu.vector_store %arg6[%c0_28, %c0_29, %c32], %67 {strides = array<i32>} : memref<2x8x64xbf16, #tpu.memory_space<vmem>>, vector<2x8x16xbf16>,
    %69 = vector.extract_strided_slice %5 {offsets = [0, 0, 48], sizes = [2, 8, 16], strides = [1, 1, 1]} : vector<2x8x192xbf16> to vector<2x8x16xbf16>
    %70 = vector.extract_strided_slice %5 {offsets = [0, 0, 112], sizes = [2, 8, 16], strides = [1, 1, 1]} : vector<2x8x192xbf16> to vector<2x8x16xbf16>
    %71 = vector.extract_strided_slice %5 {offsets = [0, 0, 176], sizes = [2, 8, 16], strides = [1, 1, 1]} : vector<2x8x192xbf16> to vector<2x8x16xbf16>
    "tpu.trace_start"() <{level = 10 : i32, message = "bqd,bkd->bqk"}> : () -> ()
    %cst_30 = arith.constant dense<0.000000e+00> : vector<2x8x8xf32>
    %72 = tpu.matmul %69, %70, %cst_30 {dimension_numbers = #tpu.dot_dimension_numbers<[2], [2], [1], [1], [0, 0, 0, 1, 1, 1], [0], [0]>} : vector<2x8x16xbf16>, vector<2x8x16xbf16>, vector<2x8x8xf32> -> vector<2x8x8xf32>
    %cst_31 = arith.constant -1.000000e+08 : f32
    "tpu.trace_stop"() : () -> ()
    %73 = vector.broadcast %cst_31 : f32 to vector<2x8x8xf32>
    %74 = arith.select %8, %72, %73 : vector<2x8x8xi1>, vector<2x8x8xf32>
    %cst_32 = arith.constant dense<0xFF800000> : vector<2x8xf32>
    %75 = vector.multi_reduction <maximumf>, %74, %cst_32 [2] : vector<2x8x8xf32> to vector<2x8xf32>
    %76 = vector.shape_cast %75 : vector<2x8xf32> to vector<2x8x1xf32>
    %77 = vector.broadcast %76 : vector<2x8x1xf32> to vector<2x8x8xf32>
    %78 = arith.subf %74, %77 : vector<2x8x8xf32>
    %79 = math.exp %78 : vector<2x8x8xf32>
    %cst_33 = arith.constant dense<0.000000e+00> : vector<2x8xf32>
    %80 = vector.multi_reduction <add>, %79, %cst_33 [2] : vector<2x8x8xf32> to vector<2x8xf32>
    %81 = vector.shape_cast %80 : vector<2x8xf32> to vector<2x8x1xf32>
    %82 = arith.truncf %79 : vector<2x8x8xf32> to vector<2x8x8xbf16>
    "tpu.trace_start"() <{level = 10 : i32, message = "bqk,bkd->bqd"}> : () -> ()
    %cst_34 = arith.constant dense<0.000000e+00> : vector<2x8x16xf32>
    %83 = tpu.matmul %82, %71, %cst_34 {dimension_numbers = #tpu.dot_dimension_numbers<[2], [1], [1], [2], [0, 0, 0, 1, 1, 2], [0], [0]>} : vector<2x8x8xbf16>, vector<2x8x16xbf16>, vector<2x8x16xf32> -> vector<2x8x16xf32>
    "tpu.trace_stop"() : () -> ()
    %84 = tpu.reciprocal %81 {approx = true} : vector<2x8x1xf32> -> vector<2x8x1xf32>
    %85 = vector.broadcast %84 : vector<2x8x1xf32> to vector<2x8x16xf32>
    %86 = arith.mulf %83, %85 : vector<2x8x16xf32>
    %87 = arith.truncf %86 : vector<2x8x16xf32> to vector<2x8x16xbf16>
    %c0_35 = arith.constant 0 : index
    %c0_36 = arith.constant 0 : index
    %c48 = arith.constant 48 : index
    %88 = vector.load %arg6[%c0_35, %c0_36, %c48] : memref<2x8x64xbf16, #tpu.memory_space<vmem>>, vector<2x8x16xbf16>
    tpu.vector_store %arg6[%c0_35, %c0_36, %c48], %87 {strides = array<i32>} : memref<2x8x64xbf16, #tpu.memory_space<vmem>>, vector<2x8x16xbf16>,
    %c0_37 = arith.constant 0 : index
    %c0_38 = arith.constant 0 : index
    %c0_39 = arith.constant 0 : index
    %89 = vector.load %arg6[%c0_37, %c0_38, %c0_39] : memref<2x8x64xbf16, #tpu.memory_space<vmem>>, vector<2x8x64xbf16>
    %90 = vector.shape_cast %89 : vector<2x8x64xbf16> to vector<16x64xbf16>
    %c0_40 = arith.constant 0 : index
    %c0_41 = arith.constant 0 : index
    %91 = vector.load %arg4[%c0_40, %c0_41] : memref<64x32xbf16, #tpu.memory_space<vmem>>, vector<64x32xbf16>
    %cst_42 = arith.constant dense<0.000000e+00> : vector<16x32xf32>
    %92 = tpu.matmul %90, %91, %cst_42 {dimension_numbers = #tpu.dot_dimension_numbers<[1], [0], [0], [1], [0, 0, 1, 1], [], []>} : vector<16x64xbf16>, vector<64x32xbf16>, vector<16x32xf32> -> vector<16x32xf32>
    %93 = vector.shape_cast %92 : vector<16x32xf32> to vector<2x8x32xf32>
    %c0_43 = arith.constant 0 : index
    %c0_44 = arith.constant 0 : index
    %c0_45 = arith.constant 0 : index
    %94 = vector.load %arg5[%c0_43, %c0_44, %c0_45] : memref<2x8x32xf32, #tpu.memory_space<vmem>>, vector<2x8x32xf32>
    tpu.vector_store %arg5[%c0_43, %c0_44, %c0_45], %93 {strides = array<i32>} : memref<2x8x32xf32, #tpu.memory_space<vmem>>, vector<2x8x32xf32>,
    return
  }
  func.func @transform_0(%arg0: i32) -> (i32, i32, i32) {
    %c0_i32 = arith.constant 0 : i32
    %c0_i32_0 = arith.constant 0 : i32
    %c0_i32_1 = arith.constant 0 : i32
    return %arg0, %c0_i32, %c0_i32_0 : i32, i32, i32
  }
  func.func @transform_1(%arg0: i32) -> (i32, i32, i32) {
    %c0_i32 = arith.constant 0 : i32
    %c0_i32_0 = arith.constant 0 : i32
    %c0_i32_1 = arith.constant 0 : i32
    return %arg0, %c0_i32, %c0_i32_0 : i32, i32, i32
  }
  func.func @transform_2(%arg0: i32) -> (i32, i32) {
    %c0_i32 = arith.constant 0 : i32
    %c0_i32_0 = arith.constant 0 : i32
    %c0_i32_1 = arith.constant 0 : i32
    return %c0_i32, %c0_i32_0 : i32, i32
  }
  func.func @transform_3(%arg0: i32) -> (i32, i32) {
    %c0_i32 = arith.constant 0 : i32
    %c0_i32_0 = arith.constant 0 : i32
    %c0_i32_1 = arith.constant 0 : i32
    return %c0_i32, %c0_i32_0 : i32, i32
  }
  func.func @transform_4(%arg0: i32) -> (i32, i32, i32) {
    %c0_i32 = arith.constant 0 : i32
    %c0_i32_0 = arith.constant 0 : i32
    %c0_i32_1 = arith.constant 0 : i32
    return %arg0, %c0_i32, %c0_i32_0 : i32, i32, i32
  }
}

module attributes {stable_mosaic.version = 11 : i64} {
  func.func @mhsa_kernel(%arg0: i32, %arg1: memref<2x8x32xbf16, #tpu.memory_space<vmem>>, %arg2: memref<2x8x8xbf16, #tpu.memory_space<vmem>>, %arg3: memref<32x192xbf16, #tpu.memory_space<vmem>>, %arg4: memref<64x32xbf16, #tpu.memory_space<vmem>>, %arg5: memref<2x8x32xf32, #tpu.memory_space<vmem>>, %arg6: memref<2x8x64xbf16, #tpu.memory_space<vmem>>) attributes {dimension_semantics = [#tpu.dimension_semantics<parallel>], iteration_bounds = array<i64: 1>, scalar_prefetch = 0 : i64, scratch_operands = 1 : i64, tpu.core_type = #tpu.core_type<tc>, window_params = [{transform_indices = @transform_0, window_bounds = array<i64: 2, 8, 32>}, {transform_indices = @transform_1, window_bounds = array<i64: 2, 8, 8>}, {pipeline_mode = #tpu.pipeline_mode<synchronous>, transform_indices = @transform_2, window_bounds = array<i64: 32, 192>}, {pipeline_mode = #tpu.pipeline_mode<synchronous>, transform_indices = @transform_3, window_bounds = array<i64: 64, 32>}, {transform_indices = @transform_4, window_bounds = array<i64: 2, 8, 32>}]} {
    %c0 = arith.constant 0 : index
    %c0_0 = arith.constant 0 : index
    %c0_1 = arith.constant 0 : index
    %0 = vector.load %arg1[%c0, %c0_0, %c0_1] : memref<2x8x32xbf16, #tpu.memory_space<vmem>>, vector<2x8x32xbf16>
    %1 = vector.shape_cast %0 : vector<2x8x32xbf16> to vector<16x32xbf16>
    %c0_2 = arith.constant 0 : index
    %c0_3 = arith.constant 0 : index
    %2 = vector.load %arg3[%c0_2, %c0_3] : memref<32x192xbf16, #tpu.memory_space<vmem>>, vector<32x192xbf16>
    %cst = arith.constant dense<0.000000e+00> : vector<16x192xf32>
    %3 = tpu.matmul %1, %2, %cst {dimension_numbers = #tpu.dot_dimension_numbers<[1], [0], [0], [1], [0, 0, 1, 1], [], []>} : vector<16x32xbf16>, vector<32x192xbf16>, vector<16x192xf32> -> vector<16x192xf32>
    %4 = arith.truncf %3 : vector<16x192xf32> to vector<16x192xbf16>
    %5 = vector.shape_cast %4 : vector<16x192xbf16> to vector<2x8x192xbf16>
    %c0_4 = arith.constant 0 : index
    %c0_5 = arith.constant 0 : index
    %c0_6 = arith.constant 0 : index
    %6 = vector.load %arg2[%c0_4, %c0_5, %c0_6] : memref<2x8x8xbf16, #tpu.memory_space<vmem>>, vector<2x8x8xbf16>
    %cst_7 = arith.constant 0.000000e+00 : bf16
    %7 = vector.broadcast %cst_7 : bf16 to vector<2x8x8xbf16>
    %8 = arith.cmpf one, %6, %7 : vector<2x8x8xbf16>
    %9 = vector.extract_strided_slice %5 {offsets = [0, 0, 0], sizes = [2, 8, 16], strides = [1, 1, 1]} : vector<2x8x192xbf16> to vector<2x8x16xbf16>
    %10 = vector.extract_strided_slice %5 {offsets = [0, 0, 64], sizes = [2, 8, 16], strides = [1, 1, 1]} : vector<2x8x192xbf16> to vector<2x8x16xbf16>
    %11 = vector.extract_strided_slice %5 {offsets = [0, 0, 128], sizes = [2, 8, 16], strides = [1, 1, 1]} : vector<2x8x192xbf16> to vector<2x8x16xbf16>
    "tpu.trace_start"() <{level = 10 : i32, message = "bqd,bkd->bqk"}> : () -> ()
    %cst_8 = arith.constant dense<0.000000e+00> : vector<2x8x8xf32>
    %12 = tpu.matmul %9, %10, %cst_8 {dimension_numbers = #tpu.dot_dimension_numbers<[2], [2], [1], [1], [0, 0, 0, 1, 1, 1], [0], [0]>} : vector<2x8x16xbf16>, vector<2x8x16xbf16>, vector<2x8x8xf32> -> vector<2x8x8xf32>
    %cst_9 = arith.constant -1.000000e+08 : f32
    "tpu.trace_stop"() : () -> ()
    %13 = vector.broadcast %cst_9 : f32 to vector<2x8x8xf32>
    %14 = arith.select %8, %12, %13 : vector<2x8x8xi1>, vector<2x8x8xf32>
    %cst_10 = arith.constant dense<0xFF800000> : vector<2x8xf32>
    %15 = vector.multi_reduction <maximumf>, %14, %cst_10 [2] : vector<2x8x8xf32> to vector<2x8xf32>
    %16 = vector.shape_cast %15 : vector<2x8xf32> to vector<2x8x1xf32>
    %17 = vector.broadcast %16 : vector<2x8x1xf32> to vector<2x8x8xf32>
    %18 = arith.subf %14, %17 : vector<2x8x8xf32>
    %19 = math.exp %18 : vector<2x8x8xf32>
    %cst_11 = arith.constant dense<0.000000e+00> : vector<2x8xf32>
    %20 = vector.multi_reduction <add>, %19, %cst_11 [2] : vector<2x8x8xf32> to vector<2x8xf32>
    %21 = vector.shape_cast %20 : vector<2x8xf32> to vector<2x8x1xf32>
    %22 = arith.truncf %19 : vector<2x8x8xf32> to vector<2x8x8xbf16>
    "tpu.trace_start"() <{level = 10 : i32, message = "bqk,bkd->bqd"}> : () -> ()
    %cst_12 = arith.constant dense<0.000000e+00> : vector<2x8x16xf32>
    %23 = tpu.matmul %22, %11, %cst_12 {dimension_numbers = #tpu.dot_dimension_numbers<[2], [1], [1], [2], [0, 0, 0, 1, 1, 2], [0], [0]>} : vector<2x8x8xbf16>, vector<2x8x16xbf16>, vector<2x8x16xf32> -> vector<2x8x16xf32>
    "tpu.trace_stop"() : () -> ()
    %24 = tpu.reciprocal %21 {approx = true} : vector<2x8x1xf32> -> vector<2x8x1xf32>
    %25 = vector.broadcast %24 : vector<2x8x1xf32> to vector<2x8x16xf32>
    %26 = arith.mulf %23, %25 : vector<2x8x16xf32>
    %27 = arith.truncf %26 : vector<2x8x16xf32> to vector<2x8x16xbf16>
    %c0_13 = arith.constant 0 : index
    %c0_14 = arith.constant 0 : index
    %c0_15 = arith.constant 0 : index
    %28 = vector.load %arg6[%c0_13, %c0_14, %c0_15] : memref<2x8x64xbf16, #tpu.memory_space<vmem>>, vector<2x8x16xbf16>
    tpu.vector_store %arg6[%c0_13, %c0_14, %c0_15], %27 {strides = array<i32>} : memref<2x8x64xbf16, #tpu.memory_space<vmem>>, vector<2x8x16xbf16>,
    %29 = vector.extract_strided_slice %5 {offsets = [0, 0, 16], sizes = [2, 8, 16], strides = [1, 1, 1]} : vector<2x8x192xbf16> to vector<2x8x16xbf16>
    %30 = vector.extract_strided_slice %5 {offsets = [0, 0, 80], sizes = [2, 8, 16], strides = [1, 1, 1]} : vector<2x8x192xbf16> to vector<2x8x16xbf16>
    %31 = vector.extract_strided_slice %5 {offsets = [0, 0, 144], sizes = [2, 8, 16], strides = [1, 1, 1]} : vector<2x8x192xbf16> to vector<2x8x16xbf16>
    "tpu.trace_start"() <{level = 10 : i32, message = "bqd,bkd->bqk"}> : () -> ()
    %cst_16 = arith.constant dense<0.000000e+00> : vector<2x8x8xf32>
    %32 = tpu.matmul %29, %30, %cst_16 {dimension_numbers = #tpu.dot_dimension_numbers<[2], [2], [1], [1], [0, 0, 0, 1, 1, 1], [0], [0]>} : vector<2x8x16xbf16>, vector<2x8x16xbf16>, vector<2x8x8xf32> -> vector<2x8x8xf32>
    %cst_17 = arith.constant -1.000000e+08 : f32
    "tpu.trace_stop"() : () -> ()
    %33 = vector.broadcast %cst_17 : f32 to vector<2x8x8xf32>
    %34 = arith.select %8, %32, %33 : vector<2x8x8xi1>, vector<2x8x8xf32>
    %cst_18 = arith.constant dense<0xFF800000> : vector<2x8xf32>
    %35 = vector.multi_reduction <maximumf>, %34, %cst_18 [2] : vector<2x8x8xf32> to vector<2x8xf32>
    %36 = vector.shape_cast %35 : vector<2x8xf32> to vector<2x8x1xf32>
    %37 = vector.broadcast %36 : vector<2x8x1xf32> to vector<2x8x8xf32>
    %38 = arith.subf %34, %37 : vector<2x8x8xf32>
    %39 = math.exp %38 : vector<2x8x8xf32>
    %cst_19 = arith.constant dense<0.000000e+00> : vector<2x8xf32>
    %40 = vector.multi_reduction <add>, %39, %cst_19 [2] : vector<2x8x8xf32> to vector<2x8xf32>
    %41 = vector.shape_cast %40 : vector<2x8xf32> to vector<2x8x1xf32>
    %42 = arith.truncf %39 : vector<2x8x8xf32> to vector<2x8x8xbf16>
    "tpu.trace_start"() <{level = 10 : i32, message = "bqk,bkd->bqd"}> : () -> ()
    %cst_20 = arith.constant dense<0.000000e+00> : vector<2x8x16xf32>
    %43 = tpu.matmul %42, %31, %cst_20 {dimension_numbers = #tpu.dot_dimension_numbers<[2], [1], [1], [2], [0, 0, 0, 1, 1, 2], [0], [0]>} : vector<2x8x8xbf16>, vector<2x8x16xbf16>, vector<2x8x16xf32> -> vector<2x8x16xf32>
    "tpu.trace_stop"() : () -> ()
    %44 = tpu.reciprocal %41 {approx = true} : vector<2x8x1xf32> -> vector<2x8x1xf32>
    %45 = vector.broadcast %44 : vector<2x8x1xf32> to vector<2x8x16xf32>
    %46 = arith.mulf %43, %45 : vector<2x8x16xf32>
    %47 = arith.truncf %46 : vector<2x8x16xf32> to vector<2x8x16xbf16>
    %c0_21 = arith.constant 0 : index
    %c0_22 = arith.constant 0 : index
    %c16 = arith.constant 16 : index
    %48 = vector.load %arg6[%c0_21, %c0_22, %c16] : memref<2x8x64xbf16, #tpu.memory_space<vmem>>, vector<2x8x16xbf16>
    tpu.vector_store %arg6[%c0_21, %c0_22, %c16], %47 {strides = array<i32>} : memref<2x8x64xbf16, #tpu.memory_space<vmem>>, vector<2x8x16xbf16>,
    %49 = vector.extract_strided_slice %5 {offsets = [0, 0, 32], sizes = [2, 8, 16], strides = [1, 1, 1]} : vector<2x8x192xbf16> to vector<2x8x16xbf16>
    %50 = vector.extract_strided_slice %5 {offsets = [0, 0, 96], sizes = [2, 8, 16], strides = [1, 1, 1]} : vector<2x8x192xbf16> to vector<2x8x16xbf16>
    %51 = vector.extract_strided_slice %5 {offsets = [0, 0, 160], sizes = [2, 8, 16], strides = [1, 1, 1]} : vector<2x8x192xbf16> to vector<2x8x16xbf16>
    "tpu.trace_start"() <{level = 10 : i32, message = "bqd,bkd->bqk"}> : () -> ()
    %cst_23 = arith.constant dense<0.000000e+00> : vector<2x8x8xf32>
    %52 = tpu.matmul %49, %50, %cst_23 {dimension_numbers = #tpu.dot_dimension_numbers<[2], [2], [1], [1], [0, 0, 0, 1, 1, 1], [0], [0]>} : vector<2x8x16xbf16>, vector<2x8x16xbf16>, vector<2x8x8xf32> -> vector<2x8x8xf32>
    %cst_24 = arith.constant -1.000000e+08 : f32
    "tpu.trace_stop"() : () -> ()
    %53 = vector.broadcast %cst_24 : f32 to vector<2x8x8xf32>
    %54 = arith.select %8, %52, %53 : vector<2x8x8xi1>, vector<2x8x8xf32>
    %cst_25 = arith.constant dense<0xFF800000> : vector<2x8xf32>
    %55 = vector.multi_reduction <maximumf>, %54, %cst_25 [2] : vector<2x8x8xf32> to vector<2x8xf32>
    %56 = vector.shape_cast %55 : vector<2x8xf32> to vector<2x8x1xf32>
    %57 = vector.broadcast %56 : vector<2x8x1xf32> to vector<2x8x8xf32>
    %58 = arith.subf %54, %57 : vector<2x8x8xf32>
    %59 = math.exp %58 : vector<2x8x8xf32>
    %cst_26 = arith.constant dense<0.000000e+00> : vector<2x8xf32>
    %60 = vector.multi_reduction <add>, %59, %cst_26 [2] : vector<2x8x8xf32> to vector<2x8xf32>
    %61 = vector.shape_cast %60 : vector<2x8xf32> to vector<2x8x1xf32>
    %62 = arith.truncf %59 : vector<2x8x8xf32> to vector<2x8x8xbf16>
    "tpu.trace_start"() <{level = 10 : i32, message = "bqk,bkd->bqd"}> : () -> ()
    %cst_27 = arith.constant dense<0.000000e+00> : vector<2x8x16xf32>
    %63 = tpu.matmul %62, %51, %cst_27 {dimension_numbers = #tpu.dot_dimension_numbers<[2], [1], [1], [2], [0, 0, 0, 1, 1, 2], [0], [0]>} : vector<2x8x8xbf16>, vector<2x8x16xbf16>, vector<2x8x16xf32> -> vector<2x8x16xf32>
    "tpu.trace_stop"() : () -> ()
    %64 = tpu.reciprocal %61 {approx = true} : vector<2x8x1xf32> -> vector<2x8x1xf32>
    %65 = vector.broadcast %64 : vector<2x8x1xf32> to vector<2x8x16xf32>
    %66 = arith.mulf %63, %65 : vector<2x8x16xf32>
    %67 = arith.truncf %66 : vector<2x8x16xf32> to vector<2x8x16xbf16>
    %c0_28 = arith.constant 0 : index
    %c0_29 = arith.constant 0 : index
    %c32 = arith.constant 32 : index
    %68 = vector.load %arg6[%c0_28, %c0_29, %c32] : memref<2x8x64xbf16, #tpu.memory_space<vmem>>, vector<2x8x16xbf16>
    tpu.vector_store %arg6[%c0_28, %c0_29, %c32], %67 {strides = array<i32>} : memref<2x8x64xbf16, #tpu.memory_space<vmem>>, vector<2x8x16xbf16>,
    %69 = vector.extract_strided_slice %5 {offsets = [0, 0, 48], sizes = [2, 8, 16], strides = [1, 1, 1]} : vector<2x8x192xbf16> to vector<2x8x16xbf16>
    %70 = vector.extract_strided_slice %5 {offsets = [0, 0, 112], sizes = [2, 8, 16], strides = [1, 1, 1]} : vector<2x8x192xbf16> to vector<2x8x16xbf16>
    %71 = vector.extract_strided_slice %5 {offsets = [0, 0, 176], sizes = [2, 8, 16], strides = [1, 1, 1]} : vector<2x8x192xbf16> to vector<2x8x16xbf16>
    "tpu.trace_start"() <{level = 10 : i32, message = "bqd,bkd->bqk"}> : () -> ()
    %cst_30 = arith.constant dense<0.000000e+00> : vector<2x8x8xf32>
    %72 = tpu.matmul %69, %70, %cst_30 {dimension_numbers = #tpu.dot_dimension_numbers<[2], [2], [1], [1], [0, 0, 0, 1, 1, 1], [0], [0]>} : vector<2x8x16xbf16>, vector<2x8x16xbf16>, vector<2x8x8xf32> -> vector<2x8x8xf32>
    %cst_31 = arith.constant -1.000000e+08 : f32
    "tpu.trace_stop"() : () -> ()
    %73 = vector.broadcast %cst_31 : f32 to vector<2x8x8xf32>
    %74 = arith.select %8, %72, %73 : vector<2x8x8xi1>, vector<2x8x8xf32>
    %cst_32 = arith.constant dense<0xFF800000> : vector<2x8xf32>
    %75 = vector.multi_reduction <maximumf>, %74, %cst_32 [2] : vector<2x8x8xf32> to vector<2x8xf32>
    %76 = vector.shape_cast %75 : vector<2x8xf32> to vector<2x8x1xf32>
    %77 = vector.broadcast %76 : vector<2x8x1xf32> to vector<2x8x8xf32>
    %78 = arith.subf %74, %77 : vector<2x8x8xf32>
    %79 = math.exp %78 : vector<2x8x8xf32>
    %cst_33 = arith.constant dense<0.000000e+00> : vector<2x8xf32>
    %80 = vector.multi_reduction <add>, %79, %cst_33 [2] : vector<2x8x8xf32> to vector<2x8xf32>
    %81 = vector.shape_cast %80 : vector<2x8xf32> to vector<2x8x1xf32>
    %82 = arith.truncf %79 : vector<2x8x8xf32> to vector<2x8x8xbf16>
    "tpu.trace_start"() <{level = 10 : i32, message = "bqk,bkd->bqd"}> : () -> ()
    %cst_34 = arith.constant dense<0.000000e+00> : vector<2x8x16xf32>
    %83 = tpu.matmul %82, %71, %cst_34 {dimension_numbers = #tpu.dot_dimension_numbers<[2], [1], [1], [2], [0, 0, 0, 1, 1, 2], [0], [0]>} : vector<2x8x8xbf16>, vector<2x8x16xbf16>, vector<2x8x16xf32> -> vector<2x8x16xf32>
    "tpu.trace_stop"() : () -> ()
    %84 = tpu.reciprocal %81 {approx = true} : vector<2x8x1xf32> -> vector<2x8x1xf32>
    %85 = vector.broadcast %84 : vector<2x8x1xf32> to vector<2x8x16xf32>
    %86 = arith.mulf %83, %85 : vector<2x8x16xf32>
    %87 = arith.truncf %86 : vector<2x8x16xf32> to vector<2x8x16xbf16>
    %c0_35 = arith.constant 0 : index
    %c0_36 = arith.constant 0 : index
    %c48 = arith.constant 48 : index
    %88 = vector.load %arg6[%c0_35, %c0_36, %c48] : memref<2x8x64xbf16, #tpu.memory_space<vmem>>, vector<2x8x16xbf16>
    tpu.vector_store %arg6[%c0_35, %c0_36, %c48], %87 {strides = array<i32>} : memref<2x8x64xbf16, #tpu.memory_space<vmem>>, vector<2x8x16xbf16>,
    %c0_37 = arith.constant 0 : index
    %c0_38 = arith.constant 0 : index
    %c0_39 = arith.constant 0 : index
    %89 = vector.load %arg6[%c0_37, %c0_38, %c0_39] : memref<2x8x64xbf16, #tpu.memory_space<vmem>>, vector<2x8x64xbf16>
    %90 = vector.shape_cast %89 : vector<2x8x64xbf16> to vector<16x64xbf16>
    %c0_40 = arith.constant 0 : index
    %c0_41 = arith.constant 0 : index
    %91 = vector.load %arg4[%c0_40, %c0_41] : memref<64x32xbf16, #tpu.memory_space<vmem>>, vector<64x32xbf16>
    %cst_42 = arith.constant dense<0.000000e+00> : vector<16x32xf32>
    %92 = tpu.matmul %90, %91, %cst_42 {dimension_numbers = #tpu.dot_dimension_numbers<[1], [0], [0], [1], [0, 0, 1, 1], [], []>} : vector<16x64xbf16>, vector<64x32xbf16>, vector<16x32xf32> -> vector<16x32xf32>
    %93 = vector.shape_cast %92 : vector<16x32xf32> to vector<2x8x32xf32>
    %c0_43 = arith.constant 0 : index
    %c0_44 = arith.constant 0 : index
    %c0_45 = arith.constant 0 : index
    %94 = vector.load %arg5[%c0_43, %c0_44, %c0_45] : memref<2x8x32xf32, #tpu.memory_space<vmem>>, vector<2x8x32xf32>
    tpu.vector_store %arg5[%c0_43, %c0_44, %c0_45], %93 {strides = array<i32>} : memref<2x8x32xf32, #tpu.memory_space<vmem>>, vector<2x8x32xf32>,
    return
  }
  func.func @transform_0(%arg0: i32) -> (i32, i32, i32) {
    %c0_i32 = arith.constant 0 : i32
    %c0_i32_0 = arith.constant 0 : i32
    %c0_i32_1 = arith.constant 0 : i32
    return %arg0, %c0_i32, %c0_i32_0 : i32, i32, i32
  }
  func.func @transform_1(%arg0: i32) -> (i32, i32, i32) {
    %c0_i32 = arith.constant 0 : i32
    %c0_i32_0 = arith.constant 0 : i32
    %c0_i32_1 = arith.constant 0 : i32
    return %arg0, %c0_i32, %c0_i32_0 : i32, i32, i32
  }
  func.func @transform_2(%arg0: i32) -> (i32, i32) {
    %c0_i32 = arith.constant 0 : i32
    %c0_i32_0 = arith.constant 0 : i32
    %c0_i32_1 = arith.constant 0 : i32
    return %c0_i32, %c0_i32_0 : i32, i32
  }
  func.func @transform_3(%arg0: i32) -> (i32, i32) {
    %c0_i32 = arith.constant 0 : i32
    %c0_i32_0 = arith.constant 0 : i32
    %c0_i32_1 = arith.constant 0 : i32
    return %c0_i32, %c0_i32_0 : i32, i32
  }
  func.func @transform_4(%arg0: i32) -> (i32, i32, i32) {
    %c0_i32 = arith.constant 0 : i32
    %c0_i32_0 = arith.constant 0 : i32
    %c0_i32_1 = arith.constant 0 : i32
    return %arg0, %c0_i32, %c0_i32_0 : i32, i32, i32
  }
}

</mosaic_0001>

<bundles_post_ra>
// kernel: tpu_custom_call.1
= control target key start
LH: loop header
LB: loop body
LE: loop exit
PB: predicated region body
PF: predicated region fallthrough
CT: control target
= control target key end

     0   :  { %s1036_s0 = inlined_call_operand.vmem [shape: bf16[2,8,32], index: 0, kind: input, shape index: {}]   ;;  %s1037_s1 = inlined_call_operand.vmem [shape: bf16[2,8,8], index: 1, kind: input, shape index: {}]   ;;  %s1038_s2 = inlined_call_operand.vmem [shape: bf16[32,192], index: 2, kind: input, shape index: {}]   ;;  %s1039_s3 = inlined_call_operand.vmem [shape: bf16[64,32], index: 3, kind: input, shape index: {}]   ;;  %s1040_s4 = inlined_call_operand.hbm [shape: f32[2,8,32], index: 4, kind: output, shape index: {}]  }
   0x1   :  { %v690_v0 = vld [vmem:[%s1038_s2 + $0x10] sm:$0xf]  ;;  %v739_v1 = vld [vmem:[%s1038_s2 + $0x14] sm:$0xf0]  ;;  %v738_v2 = vld [vmem:[%s1038_s2 + $0x14] sm:$0xf] }
   0x2   :  { %v691_v3 = vor.u32 %v739_v1, %v690_v0  ;;  %v692_v4 = vld [vmem:[%s1038_s2 + $0x18] sm:$0xf0]  ;;  %v682_v5 = vld [vmem:[%s1038_s2] sm:$0xf]  ;;  %v737_v6 = vld [vmem:[%s1038_s2 + $0x4] sm:$0xf0] }
   0x3   :  { %v695_v7 = vor.u32 %v738_v2, %v692_v4  ;;  %v736_v8 = vld [vmem:[%s1038_s2 + $0x4] sm:$0xf]  ;;  %v684_v9 = vld [vmem:[%s1038_s2 + $0x8] sm:$0xf0]  ;;  %v683_v10 = vor.u32 %v737_v6, %v682_v5 }
   0x4   :  { %60 = vmatpush.bf16.msra.mxu0 %v691_v3 }
   0x5   :  { %9 = vsyncpa [#allocation4], 0  ;;  %74 = vmatpush.bf16.msra.mxu1 %v695_v7  ;;  %v687_v11 = vor.u32 %v736_v8, %v684_v9  ;;  %v735_v12 = vld [vmem:[%s1036_s0] sm:$0xff]  ;;  %vm50_vm0 = vcmask 261120   ;;  %vm166_vm1 = vcmask 1043456   ;;  %s817_s0 = smov 112  }
   0x6   :  { %s818_s2 = smov 48   ;;  %s819_s7 = smov 64   ;;  %vm95_vm2 = vcmask 130048   ;;  %v746_v49 = vld [vmem:[%s1037_s1] sm:$0xff]   ;;  %vm141_vm4 = vcmask 64512   ;;  %vm209_vm6 = vcmask 125952  }
   0x7   :  { %s820_s8 = smov 96   ;;  %s821_s9 = smov 32   ;;  %v747_v50 = vunpack.c.l.bf16 %v746_v49  ;;  %v748_v55 = vunpack.c.h.bf16 %v746_v49  ;;  %vm338_vm7 = vcmask 257152   ;;  %vm467_vm8 = vcmask 388352  }
   0x8   :  { %61 = vmatpush.bf16.msra.mxu0 %v683_v10  ;;  %s822_s10 = smov 16   ;;  %s823_s11 = smov 80   ;;  %vm596_vm9 = vcmask 519552   ;;  %vm638_vm10 = vcmask 523264  }
   0x9   :  { %75 = vmatpush.bf16.msra.mxu1 %v687_v11  ;;  %vm924_vm3 = vcmp.ne.f32.partialorder %v747_v50, 0.0  ;;  %vm931_vm5 = vcmp.ne.f32.partialorder %v748_v55, 0.0  ;;  %s824_s21 = smov [#allocation3]   ;;  %s664_s25 = sshll.u32 %s1040_s4, 4  ;;  %s665_s25 = int_to_ptr.hbm [resolvable:$true] %s664_s25 }
   0xa   :  { %s662_s22 = sshll.u32 %s824_s21, 4  ;;  %s826_s26 = smov 8   ;;  %s663_s22 = int_to_ptr.vmem [resolvable:$true] %s662_s22 }
   0xb   :  { %696 = vmatmul.msk.bf16.vlgmr.msra.gmra.mxu0 %vm50_vm0, %v735_v12 }
   0xc   :  { %697 = vmatmul.msk.bf16.vlgmr.msra.gmra.mxu1 %vm50_vm0, %v735_v12 }
  0x88   :  { %v63_v13 = vpop.f32.mrf.mxu0 }
  0x89   :  { %v77_v14 = vpop.f32.mrf.mxu1 }
  0x8a   :  { %v881_v15 = vpack.c.bf16 %v77_v14, %v63_v13 }
  0x8c   :  { %v91_v16 = vunpack.c.l.b16 %v881_v15  ;;  %v162_v17 = vrot.slane %v881_v15, 4 }
  0x8e   :  { %v92_v18 = vpack.c.b16 %v91_v16, %v91_v16  ;;  %v168_v19 = vsel %vm166_vm1, %v162_v17, 0 }
  0x8f   :  { %177 = vmatpush.bf16.msrb.mxu0 %v168_v19 }
  0x90   :  { %212 = vrot.lane.b32.xlu2 %v92_v18, %s817_s0  ;;  %214 = vrot.lane.b32.xlu1 %v92_v18, %s818_s2  ;;  %v65_v20 = vpop.f32.mrf.mxu0 }
  0x91   :  { %93 = vrot.lane.b32.xlu0 %v92_v18, %s819_s7  ;;  %v79_v21 = vpop.f32.mrf.mxu1 }
  0x92   :  { %v888_v22 = vpack.c.bf16 %v79_v21, %v65_v20 }
  0x94   :  { %v116_v23 = vunpack.c.l.b16 %v888_v22  ;;  %v183_v24 = vrot.slane %v888_v22, 4 }
  0x96   :  { %v117_v25 = vpack.c.b16 %v116_v23, %v116_v23  ;;  %v188_v26 = vsel %vm166_vm1, %v183_v24, 0 }
  0x97   :  { %197 = vmatpush.bf16.msrb.mxu1 %v188_v26 }
  0x98   :  { %235 = vrot.lane.b32.xlu2 %v117_v25, %s817_s0  ;;  %237 = vrot.lane.b32.xlu1 %v117_v25, %s818_s2 }
  0x99   :  { %118 = vrot.lane.b32.xlu0 %v117_v25, %s819_s7 }
  0xa0   :  { %341 = vrot.lane.b32.xlu2 %v92_v18, %s820_s8  ;;  %366 = vrot.lane.b32.xlu1 %v117_v25, %s821_s9 }
  0xa1   :  { %343 = vrot.lane.b32.xlu0 %v92_v18, %s821_s9 }
  0xa8   :  { %495 = vrot.lane.b32.xlu2 %v117_v25, %s822_s10  ;;  %472 = vrot.lane.b32.xlu1 %v92_v18, %s822_s10 }
  0xa9   :  { %364 = vrot.lane.b32.xlu0 %v117_v25, %s820_s8 }
  0xb0   :  { %493 = vrot.lane.b32.xlu1 %v117_v25, %s823_s11 }
  0xb1   :  { %470 = vrot.lane.b32.xlu0 %v92_v18, %s823_s11 }
  0xea   :  { %v213_v28 = vpop.permute.xlu2 %212 }
  0xf2   :  { %v236_v36 = vpop.permute.xlu2 %235 }
  0xfa   :  { %v342_v41 = vpop.permute.xlu2 %341 }
 0x102   :  { %v215_v27 = vpop.permute.xlu1 %214  ;;  %v496_v44 = vpop.permute.xlu2 %495 }
 0x103   :  { %v94_v29 = vpop.permute.xlu0 %93  ;;  %v220_v30 = vsel %vm95_vm2, %v215_v27, 0  ;;  %v501_v45 = vsel %vm95_vm2, %v496_v44, 0 }
 0x104   :  { %v100_v31 = vsel %vm95_vm2, %v94_v29, 0 }
 0x105   :  { %109 = vmatpush.bf16.xpose.msra.mxu2 %v100_v31 }
 0x10a   :  { %v238_v32 = vpop.permute.xlu1 %237 }
 0x10b   :  { %v119_v33 = vpop.permute.xlu0 %118  ;;  %v243_v34 = vsel %vm95_vm2, %v238_v32, 0 }
 0x10c   :  { %698 = vmatmul.msk.bf16.vlgmr.msra.gmra.mxu2 %vm95_vm2, %v881_v15  ;;  %v124_v35 = vsel %vm95_vm2, %v119_v33, 0 }
 0x10d   :  { %229 = vmatpush.bf16.xpose.msrb.mxu2 %v220_v30  ;;  %133 = vmatpush.bf16.xpose.msra.mxu3 %v124_v35 }
 0x112   :  { %v367_v37 = vpop.permute.xlu1 %366 }
 0x113   :  { %v372_v38 = vsel %vm95_vm2, %v367_v37, 0  ;;  %v344_v39 = vpop.permute.xlu0 %343 }
 0x114   :  { %v349_v40 = vsel %vm95_vm2, %v344_v39, 0  ;;  %699 = vmatmul.msk.bf16.vlgmr.msra.gmra.mxu3 %vm95_vm2, %v888_v22 }
 0x115   :  { %252 = vmatpush.bf16.xpose.msrb.mxu3 %v243_v34  ;;  %358 = vmatpush.bf16.xpose.msra.mxu2 %v349_v40 }
 0x11a   :  { %v473_v42 = vpop.permute.xlu1 %472 }
 0x11b   :  { %v478_v43 = vsel %vm95_vm2, %v473_v42, 0  ;;  %v365_v46 = vpop.permute.xlu0 %364 }
 0x11c   :  { %702 = vmatmul.msk.bf16.vlgmr.msrb.gmra.mxu2 %vm95_vm2, %v213_v28 }
 0x11d   :  { %381 = vmatpush.bf16.xpose.msra.mxu3 %v372_v38  ;;  %487 = vmatpush.bf16.xpose.msrb.mxu2 %v478_v43 }
 0x122   :  { %v494_v48 = vpop.permute.xlu1 %493 }
 0x123   :  { %v471_v47 = vpop.permute.xlu0 %470 }
 0x124   :  { %703 = vmatmul.msk.bf16.vlgmr.msrb.gmra.mxu3 %vm95_vm2, %v236_v36 }
 0x125   :  { %510 = vmatpush.bf16.xpose.msrb.mxu3 %v501_v45 }
 0x12c   :  { %706 = vmatmul.msk.bf16.vlgmr.msra.gmra.mxu2 %vm95_vm2, %v342_v41 }
 0x134   :  { %707 = vmatmul.msk.bf16.vlgmr.msra.gmra.mxu3 %vm95_vm2, %v365_v46 }
 0x13c   :  { %710 = vmatmul.msk.bf16.vlgmr.msrb.gmra.mxu2 %vm95_vm2, %v471_v47 }
 0x144   :  { %711 = vmatmul.msk.bf16.vlgmr.msrb.gmra.mxu3 %vm95_vm2, %v494_v48 }
 0x18f   :  { %v111_v52 = vpop.f32.mrf.mxu2 }
 0x190   :  { %v139_v53 = vsel %vm924_vm3, %v111_v52, -1e+08 }
 0x191   :  { %v142_v54 = vsel %vm141_vm4, %v139_v53, -inf }
 0x192   :  { %143 = vmax.xlane.f32.xlu2 %v142_v54 }
 0x197   :  { %v113_v57 = vpop.f32.mrf.mxu2  ;;  %v135_v58 = vpop.f32.mrf.mxu3 }
 0x198   :  { %v140_v59 = vsel %vm931_vm5, %v135_v58, -1e+08 }
 0x199   :  { %v145_v60 = vsel %vm141_vm4, %v140_v59, -inf }
 0x19a   :  { %146 = vmax.xlane.f32.xlu0 %v145_v60 }
 0x19f   :  { %v137_v61 = vpop.f32.mrf.mxu3  ;;  %v231_v62 = vpop.f32.mrf.mxu2 }
 0x1a0   :  { %v258_v63 = vsel %vm924_vm3, %v231_v62, -1e+08 }
 0x1a1   :  { %v260_v0 = vsel %vm141_vm4, %v258_v63, -inf }
 0x1a2   :  { %261 = vmax.xlane.f32.xlu1 %v260_v0 }
 0x1a7   :  { %v233_v1 = vpop.f32.mrf.mxu2  ;;  %v254_v2 = vpop.f32.mrf.mxu3 }
 0x1a8   :  { %v259_v3 = vsel %vm931_vm5, %v254_v2, -1e+08 }
 0x1a9   :  { %v263_v4 = vsel %vm141_vm4, %v259_v3, -inf }
 0x1aa   :  { %264 = vmax.xlane.f32.xlu2 %v263_v4 }
 0x1ae   :  { %302 = vrot.lane.b32.xlu0 %v888_v22, %s817_s0 }
 0x1af   :  { %v256_v5 = vpop.f32.mrf.mxu3  ;;  %v360_v6 = vpop.f32.mrf.mxu2 }
 0x1b0   :  { %v960_v17 = vsel %vm924_vm3, %v360_v6, -1e+08 }
 0x1b1   :  { %v389_v18 = vsel %vm141_vm4, %v960_v17, -inf }
 0x1b6   :  { %431 = vrot.lane.b32.xlu0 %v888_v22, %s820_s8 }
 0x1b7   :  { %v362_v7 = vpop.f32.mrf.mxu2  ;;  %v383_v8 = vpop.f32.mrf.mxu3 }
 0x1b8   :  { %v970_v20 = vsel %vm931_vm5, %v383_v8, -1e+08 }
 0x1b9   :  { %v392_v23 = vsel %vm141_vm4, %v970_v20, -inf }
 0x1bb   :  { %409 = vrot.lane.b32.xlu1 %v881_v15, %s820_s8 }
 0x1bf   :  { %v385_v9 = vpop.f32.mrf.mxu3  ;;  %v489_v10 = vpop.f32.mrf.mxu2 }
 0x1c0   :  { %v966_v19 = vsel %vm924_vm3, %v489_v10, -1e+08 }
 0x1c1   :  { %v518_v21 = vsel %vm141_vm4, %v966_v19, -inf }
 0x1c2   :  { %280 = vrot.lane.b32.xlu2 %v881_v15, %s817_s0 }
 0x1c7   :  { %v491_v11 = vpop.f32.mrf.mxu2  ;;  %v512_v12 = vpop.f32.mrf.mxu3 }
 0x1c8   :  { %v954_v14 = vsel %vm931_vm5, %v512_v12, -1e+08 }
 0x1c9   :  { %v521_v16 = vsel %vm141_vm4, %v954_v14, -inf }
 0x1cf   :  { %v514_v13 = vpop.f32.mrf.mxu3 }
 0x1e0   :  { %522 = vmax.xlane.f32.xlu0 %v521_v16 }
 0x1e5   :  { %390 = vmax.xlane.f32.xlu1 %v389_v18 }
 0x1eb   :  { %519 = vmax.xlane.f32.xlu2 %v518_v21 }
 0x1ed   :  { %393 = vmax.xlane.f32.xlu1 %v392_v23 }
 0x205   :  { %v144_v24 = vpop.xlane.xlu2 %143 }
 0x206   :  { %v148_v25 = vsub.f32 %v139_v53, %v144_v24  ;;  %538 = vrot.lane.b32.xlu1 %v881_v15, %s823_s11 }
 0x208   :  { %v150_v26 = vmul.f32 1.442695, %v148_v25 }
 0x20a   :  { %759 = vpow2.f32 %v150_v26 }
 0x20d   :  { %v147_v27 = vpop.xlane.xlu0 %146 }
 0x20e   :  { %v149_v28 = vsub.f32 %v140_v59, %v147_v27  ;;  %560 = vrot.lane.b32.xlu1 %v888_v22, %s823_s11 }
 0x210   :  { %v760_v29 = vpop.eup %759  ;;  %v152_v30 = vmul.f32 1.442695, %v149_v28 }
 0x211   :  { %v154_v31 = vsel %vm141_vm4, %v760_v29, 0.0  ;;  %v160_v32 = vpack.c.bf16 %v760_v29, %v760_v29 }
 0x212   :  { %761 = vpow2.f32 %v152_v30  ;;  %155 = vadd.xlane.f32.xlu0 %v154_v31 }
 0x213   :  { %700 = vmatmul.msk.bf16.vlgmr.msrb.gmra.mxu0 %vm141_vm4, %v160_v32 }
 0x215   :  { %v262_v33 = vpop.xlane.xlu1 %261 }
 0x216   :  { %v266_v15 = vsub.f32 %v258_v63, %v262_v33 }
 0x218   :  { %v982_v34 = vpop.eup %761  ;;  %v268_v36 = vmul.f32 1.442695, %v266_v15 }
 0x219   :  { %v161_v35 = vpack.c.bf16 %v982_v34, %v982_v34 }
 0x21a   :  { %763 = vpow2.f32 %v268_v36 }
 0x21b   :  { %701 = vmatmul.msk.bf16.vlgmr.msrb.gmra.mxu1 %vm141_vm4, %v161_v35 }
 0x21d   :  { %v265_v22 = vpop.xlane.xlu2 %264 }
 0x21e   :  { %v267_v37 = vsub.f32 %v259_v3, %v265_v22 }
 0x220   :  { %v270_v38 = vmul.f32 1.442695, %v267_v37  ;;  %v303_v39 = vpop.permute.xlu0 %302  ;;  %v764_v44 = vpop.eup %763 }
 0x221   :  { %v304_v40 = vrot.slane %v303_v39, 4  ;;  %v278_v51 = vpack.c.bf16 %v764_v44, %v764_v44  ;;  %v272_v56 = vsel %vm141_vm4, %v764_v44, 0.0 }
 0x222   :  { %765 = vpow2.f32 %v270_v38 }
 0x223   :  { %v309_v41 = vsel %vm166_vm1, %v304_v40, 0 }
 0x224   :  { %318 = vmatpush.bf16.msra.mxu1 %v309_v41 }
 0x225   :  { %v281_v42 = vpop.permute.xlu2 %280 }
 0x226   :  { %v282_v43 = vrot.slane %v281_v42, 4 }
 0x228   :  { %v766_v45 = vpop.eup %765  ;;  %v287_v46 = vsel %vm166_vm1, %v282_v43, 0  ;;  %v432_v47 = vpop.permute.xlu0 %431 }
 0x229   :  { %v279_v48 = vpack.c.bf16 %v766_v45, %v766_v45  ;;  %v433_v49 = vrot.slane %v432_v47, 4  ;;  %296 = vmatpush.bf16.msra.mxu0 %v287_v46  ;;  %v275_v50 = vsel %vm141_vm4, %v766_v45, 0.0 }
 0x22a   :  { %276 = vadd.xlane.f32.xlu2 %v275_v50 }
 0x22b   :  { %v438_v52 = vsel %vm166_vm1, %v433_v49, 0  ;;  %705 = vmatmul.msk.bf16.vlgmr.msra.gmra.mxu1 %vm141_vm4, %v279_v48 }
 0x22c   :  { %704 = vmatmul.msk.bf16.vlgmr.msra.gmra.mxu0 %vm141_vm4, %v278_v51  ;;  %447 = vmatpush.bf16.msrb.mxu1 %v438_v52 }
 0x22d   :  { %v410_v53 = vpop.permute.xlu1 %409 }
 0x22e   :  { %v411_v54 = vrot.slane %v410_v53, 4 }
 0x230   :  { %v416_v55 = vsel %vm166_vm1, %v411_v54, 0 }
 0x231   :  { %425 = vmatpush.bf16.msrb.mxu0 %v416_v55 }
 0x238   :  { %273 = vadd.xlane.f32.xlu1 %v272_v56 }
 0x253   :  { %v523_v62 = vpop.xlane.xlu0 %522 }
 0x254   :  { %v525_v3 = vsub.f32 %v954_v14, %v523_v62 }
 0x256   :  { %v528_v7 = vmul.f32 1.442695, %v525_v3 }
 0x258   :  { %v391_v57 = vpop.xlane.xlu1 %390 }
 0x259   :  { %v395_v58 = vsub.f32 %v960_v17, %v391_v57 }
 0x25b   :  { %v397_v59 = vmul.f32 1.442695, %v395_v58 }
 0x25d   :  { %767 = vpow2.f32 %v397_v59 }
 0x25e   :  { %v520_v60 = vpop.xlane.xlu2 %519 }
 0x25f   :  { %v524_v61 = vsub.f32 %v966_v19, %v520_v60  ;;  %v157_v19 = vsel %vm141_vm4, %v982_v34, 0.0 }
 0x260   :  { %v394_v63 = vpop.xlane.xlu1 %393 }
 0x261   :  { %v526_v0 = vmul.f32 1.442695, %v524_v61  ;;  %v396_v1 = vsub.f32 %v970_v20, %v394_v63 }
 0x263   :  { %v768_v2 = vpop.eup %767  ;;  %769 = vpow2.f32 %v526_v0  ;;  %v399_v4 = vmul.f32 1.442695, %v396_v1 }
 0x264   :  { %v407_v5 = vpack.c.bf16 %v768_v2, %v768_v2  ;;  %v401_v6 = vsel %vm141_vm4, %v768_v2, 0.0 }
 0x265   :  { %771 = vpow2.f32 %v399_v4  ;;  %402 = vadd.xlane.f32.xlu0 %v401_v6 }
 0x266   :  { %708 = vmatmul.msk.bf16.vlgmr.msrb.gmra.mxu0 %vm141_vm4, %v407_v5  ;;  %773 = vpow2.f32 %v528_v7 }
 0x269   :  { %v770_v8 = vpop.eup %769 }
 0x26a   :  { %v530_v12 = vsel %vm141_vm4, %v770_v8, 0.0  ;;  %v536_v20 = vpack.c.bf16 %v770_v8, %v770_v8 }
 0x26b   :  { %v772_v9 = vpop.eup %771 }
 0x26c   :  { %v408_v10 = vpack.c.bf16 %v772_v9, %v772_v9  ;;  %v404_v11 = vsel %vm141_vm4, %v772_v9, 0.0  ;;  %v774_v13 = vpop.eup %773 }
 0x26d   :  { %405 = vadd.xlane.f32.xlu2 %v404_v11  ;;  %531 = vadd.xlane.f32.xlu0 %v530_v12  ;;  %v533_v14 = vsel %vm141_vm4, %v774_v13, 0.0  ;;  %v537_v25 = vpack.c.bf16 %v774_v13, %v774_v13  ;;  %v743_v11 = vld [vmem:[%s1039_s3 + $0x10] sm:$0xff] }
 0x26e   :  { %709 = vmatmul.msk.bf16.vlgmr.msrb.gmra.mxu1 %vm141_vm4, %v408_v10  ;;  %v744_v10 = vld [vmem:[%s1039_s3 + $0x18] sm:$0xff] }
 0x26f   :  { %646 = vmatpush.bf16.msra.mxu2 %v744_v10 }
 0x273   :  { %647 = vmatpush.bf16.msra.mxu2 %v743_v11 }
 0x275   :  { %534 = vadd.xlane.f32.xlu2 %v533_v14  ;;  %v742_v14 = vld [vmem:[%s1039_s3 + $0x8] sm:$0xff] }
 0x277   :  { %648 = vmatpush.bf16.msra.mxu2 %v742_v14 }
 0x278   :  { %v539_v16 = vpop.permute.xlu1 %538 }
 0x279   :  { %v540_v17 = vrot.slane %v539_v16, 4  ;;  %v741_v16 = vld [vmem:[%s1039_s3] sm:$0xff]  ;;  %s825_s3 = smov 128  }
 0x27b   :  { %v545_v18 = vsel %vm166_vm1, %v540_v17, 0  ;;  %649 = vmatpush.bf16.msra.mxu2 %v741_v16 }
 0x27c   :  { %554 = vmatpush.bf16.msra.mxu0 %v545_v18 }
 0x27d   :  { %158 = vadd.xlane.f32.xlu2 %v157_v19 }
 0x27f   :  { %712 = vmatmul.msk.bf16.vlgmr.msra.gmra.mxu0 %vm141_vm4, %v536_v20 }
 0x280   :  { %v561_v21 = vpop.permute.xlu1 %560 }
 0x281   :  { %v562_v23 = vrot.slane %v561_v21, 4 }
 0x283   :  { %v567_v24 = vsel %vm166_vm1, %v562_v23, 0 }
 0x284   :  { %576 = vmatpush.bf16.msra.mxu1 %v567_v24 }
 0x285   :  { %v156_v26 = vpop.xlane.xlu0 %155 }
 0x286   :  { %775 = vrcp.f32 %v156_v26 }
 0x287   :  { %713 = vmatmul.msk.bf16.vlgmr.msra.gmra.mxu1 %vm141_vm4, %v537_v25 }
 0x28c   :  { %v776_v27 = vpop.eup %775 }
 0x290   :  { %v179_v28 = vpop.f32.mrf.mxu0 }
 0x291   :  { %v205_v29 = vmul.f32 %v776_v27, %v179_v28 }
 0x293   :  { %v207_v30 = vpack.c.bf16 %v205_v29, %v205_v29 }
 0x295   :  { %210 = vst.msk [vmem:[#allocation2] sm:$0xf] %vm209_vm6, %v207_v30 }
 0x298   :  { %v181_v31 = vpop.f32.mrf.mxu0  ;;  %v199_v32 = vpop.f32.mrf.mxu1 }
 0x29d   :  { %v277_v33 = vpop.xlane.xlu2 %276 }
 0x29e   :  { %777 = vrcp.f32 %v277_v33 }
 0x2a0   :  { %v201_v34 = vpop.f32.mrf.mxu1 }
 0x2a4   :  { %v778_v15 = vpop.eup %777 }
 0x2a8   :  { %v320_v35 = vpop.f32.mrf.mxu1 }
 0x2a9   :  { %v327_v36 = vmul.f32 %v778_v15, %v320_v35  ;;  %v298_v22 = vpop.f32.mrf.mxu0 }
 0x2ab   :  { %v329_v37 = vpack.c.bf16 %v327_v36, %v327_v36  ;;  %v274_v38 = vpop.xlane.xlu1 %273 }
 0x2ac   :  { %779 = vrcp.f32 %v274_v38 }
 0x2ad   :  { %334 = vrot.lane.b32.xlu2 %v329_v37, %s822_s10 }
 0x2b0   :  { %v322_v39 = vpop.f32.mrf.mxu1 }
 0x2b1   :  { %v300_v40 = vpop.f32.mrf.mxu0 }
 0x2b2   :  { %v780_v41 = vpop.eup %779 }
 0x2b3   :  { %v326_v42 = vmul.f32 %v780_v41, %v298_v22 }
 0x2b5   :  { %v328_v43 = vpack.c.bf16 %v326_v42, %v326_v42 }
 0x2b7   :  { %332 = vrot.lane.b32.xlu0 %v328_v43, %s822_s10 }
 0x2d8   :  { %v403_v44 = vpop.xlane.xlu0 %402 }
 0x2d9   :  { %781 = vrcp.f32 %v403_v44 }
 0x2df   :  { %v782_v46 = vpop.eup %781 }
 0x2e0   :  { %v406_v45 = vpop.xlane.xlu2 %405  ;;  %v532_v57 = vpop.xlane.xlu0 %531 }
 0x2e1   :  { %783 = vrcp.f32 %v406_v45 }
 0x2e3   :  { %v427_v47 = vpop.f32.mrf.mxu0 }
 0x2e4   :  { %v455_v48 = vmul.f32 %v782_v46, %v427_v47 }
 0x2e6   :  { %v457_v49 = vpack.c.bf16 %v455_v48, %v455_v48 }
 0x2e7   :  { %v784_v51 = vpop.eup %783 }
 0x2e8   :  { %v535_v50 = vpop.xlane.xlu2 %534  ;;  %461 = vrot.lane.b32.xlu1 %v457_v49, %s821_s9 }
 0x2eb   :  { %v429_v52 = vpop.f32.mrf.mxu0  ;;  %v449_v53 = vpop.f32.mrf.mxu1 }
 0x2ec   :  { %v456_v54 = vmul.f32 %v784_v51, %v449_v53 }
 0x2ee   :  { %v458_v55 = vpack.c.bf16 %v456_v54, %v456_v54 }
 0x2f0   :  { %463 = vrot.lane.b32.xlu0 %v458_v55, %s821_s9  ;;  %v159_v56 = vpop.xlane.xlu2 %158 }
 0x2f1   :  { %785 = vrcp.f32 %v159_v56 }
 0x2f2   :  { %787 = vrcp.f32 %v532_v57 }
 0x2f3   :  { %v451_v58 = vpop.f32.mrf.mxu1  ;;  %789 = vrcp.f32 %v535_v50 }
 0x2f7   :  { %v786_v59 = vpop.eup %785 }
 0x2f8   :  { %v206_v60 = vmul.f32 %v786_v59, %v199_v32  ;;  %v788_v62 = vpop.eup %787 }
 0x2f9   :  { %v790_v2 = vpop.eup %789 }
 0x2fa   :  { %v208_v61 = vpack.c.bf16 %v206_v60, %v206_v60 }
 0x2fc   :  { %v556_v63 = vpop.f32.mrf.mxu0  ;;  %211 = vst.msk [vmem:[#allocation2 + $0x4] sm:$0xf] %vm209_vm6, %v208_v61 }
 0x2fd   :  { %v584_v0 = vmul.f32 %v788_v62, %v556_v63 }
 0x2ff   :  { %v586_v1 = vpack.c.bf16 %v584_v0, %v584_v0 }
 0x301   :  { %590 = vrot.lane.b32.xlu2 %v586_v1, %s818_s2 }
 0x304   :  { %v558_v3 = vpop.f32.mrf.mxu0  ;;  %v578_v4 = vpop.f32.mrf.mxu1 }
 0x305   :  { %v585_v5 = vmul.f32 %v790_v2, %v578_v4 }
 0x307   :  { %v587_v6 = vpack.c.bf16 %v585_v5, %v585_v5  ;;  %v335_v7 = vpop.permute.xlu2 %334 }
 0x308   :  { %340 = vst.msk [vmem:[#allocation2 + $0x4] sm:$0xf] %vm338_vm7, %v335_v7 }
 0x309   :  { %592 = vrot.lane.b32.xlu0 %v587_v6, %s818_s2 }
 0x30c   :  { %v580_v8 = vpop.f32.mrf.mxu1 }
 0x329   :  { %v333_v9 = vpop.permute.xlu0 %332 }
 0x32a   :  { %339 = vst.msk [vmem:[#allocation2] sm:$0xf] %vm338_vm7, %v333_v9 }
 0x35a   :  { %v462_v12 = vpop.permute.xlu1 %461 }
 0x35b   :  { %468 = vst.msk [vmem:[#allocation2] sm:$0xf] %vm467_vm8, %v462_v12  ;;  %v591_v13 = vpop.permute.xlu2 %590 }
 0x35c   :  { %597 = vst.msk [vmem:[#allocation2] sm:$0xf] %vm596_vm9, %v591_v13 }
 0x362   :  { %v464_v17 = vpop.permute.xlu0 %463 }
 0x363   :  { %469 = vst.msk [vmem:[#allocation2 + $0x4] sm:$0xf] %vm467_vm8, %v464_v17 }
 0x37b   :  { %v593_v18 = vpop.permute.xlu0 %592 }
 0x37c   :  { %598 = vst.msk [vmem:[#allocation2 + $0x4] sm:$0xf] %vm596_vm9, %v593_v18 }
 0x383   :  { %v740_v19 = vld [vmem:[#allocation2] sm:$0xff] }
 0x384   :  { %734 = vmatmul.msk.bf16.vlgmr.msra.gmra.mxu2 %vm638_vm10, %v740_v19 }
 0x407   :  { %v651_v20 = vpop.f32.mrf.mxu2 }
 0x408   :  { %656 = vst.msk [vmem:[#allocation3] sm:$0xff] %vm50_vm0, %v651_v20 }
 0x40f   :  { %v653_v21 = vpop.f32.mrf.mxu2 }
 0x410   :  { %657 = vst.msk [vmem:[#allocation3 + $0x8] sm:$0xff] %vm50_vm0, %v653_v21 }
 0x411   :  { %670 = dma.vmem_to_hbm [thread:$0]  %s663_s22, 256, %s665_s25, [#allocation4], %s825_s3, %s825_s3, %s826_s26  }
 0x412   :  { %815 = dma.done.wait [#allocation4], 256  }
 0x413   :  { %816 = vsyncadd [#allocation4], 4294967040 }
 0x414   :  { %675 = vsyncpa [#allocation4], 1 }

// kernel: tpu_custom_call.1
= control target key start
LH: loop header
LB: loop body
LE: loop exit
PB: predicated region body
PF: predicated region fallthrough
CT: control target
= control target key end

     0   :  { %s1036_s0 = inlined_call_operand.vmem [shape: bf16[2,8,32], index: 0, kind: input, shape index: {}]   ;;  %s1037_s1 = inlined_call_operand.vmem [shape: bf16[2,8,8], index: 1, kind: input, shape index: {}]   ;;  %s1038_s2 = inlined_call_operand.vmem [shape: bf16[32,192], index: 2, kind: input, shape index: {}]   ;;  %s1039_s3 = inlined_call_operand.vmem [shape: bf16[64,32], index: 3, kind: input, shape index: {}]   ;;  %s1040_s4 = inlined_call_operand.hbm [shape: f32[2,8,32], index: 4, kind: output, shape index: {}]  }
   0x1   :  { %v690_v0 = vld [vmem:[%s1038_s2 + $0x10] sm:$0xf]  ;;  %v739_v1 = vld [vmem:[%s1038_s2 + $0x14] sm:$0xf0]  ;;  %v738_v2 = vld [vmem:[%s1038_s2 + $0x14] sm:$0xf] }
   0x2   :  { %v691_v3 = vor.u32 %v739_v1, %v690_v0  ;;  %v692_v4 = vld [vmem:[%s1038_s2 + $0x18] sm:$0xf0]  ;;  %v682_v5 = vld [vmem:[%s1038_s2] sm:$0xf]  ;;  %v737_v6 = vld [vmem:[%s1038_s2 + $0x4] sm:$0xf0] }
   0x3   :  { %v695_v7 = vor.u32 %v738_v2, %v692_v4  ;;  %v736_v8 = vld [vmem:[%s1038_s2 + $0x4] sm:$0xf]  ;;  %v684_v9 = vld [vmem:[%s1038_s2 + $0x8] sm:$0xf0]  ;;  %v683_v10 = vor.u32 %v737_v6, %v682_v5 }
   0x4   :  { %60 = vmatpush.bf16.msra.mxu0 %v691_v3 }
   0x5   :  { %9 = vsyncpa [#allocation4], 0  ;;  %74 = vmatpush.bf16.msra.mxu1 %v695_v7  ;;  %v687_v11 = vor.u32 %v736_v8, %v684_v9  ;;  %v735_v12 = vld [vmem:[%s1036_s0] sm:$0xff]  ;;  %vm50_vm0 = vcmask 261120   ;;  %vm166_vm1 = vcmask 1043456   ;;  %s817_s0 = smov 112  }
   0x6   :  { %s818_s2 = smov 48   ;;  %s819_s7 = smov 64   ;;  %vm95_vm2 = vcmask 130048   ;;  %v746_v49 = vld [vmem:[%s1037_s1] sm:$0xff]   ;;  %vm141_vm4 = vcmask 64512   ;;  %vm209_vm6 = vcmask 125952  }
   0x7   :  { %s820_s8 = smov 96   ;;  %s821_s9 = smov 32   ;;  %v747_v50 = vunpack.c.l.bf16 %v746_v49  ;;  %v748_v55 = vunpack.c.h.bf16 %v746_v49  ;;  %vm338_vm7 = vcmask 257152   ;;  %vm467_vm8 = vcmask 388352  }
   0x8   :  { %61 = vmatpush.bf16.msra.mxu0 %v683_v10  ;;  %s822_s10 = smov 16   ;;  %s823_s11 = smov 80   ;;  %vm596_vm9 = vcmask 519552   ;;  %vm638_vm10 = vcmask 523264  }
   0x9   :  { %75 = vmatpush.bf16.msra.mxu1 %v687_v11  ;;  %vm924_vm3 = vcmp.ne.f32.partialorder %v747_v50, 0.0  ;;  %vm931_vm5 = vcmp.ne.f32.partialorder %v748_v55, 0.0  ;;  %s824_s21 = smov [#allocation3]   ;;  %s664_s25 = sshll.u32 %s1040_s4, 4  ;;  %s665_s25 = int_to_ptr.hbm [resolvable:$true] %s664_s25 }
   0xa   :  { %s662_s22 = sshll.u32 %s824_s21, 4  ;;  %s826_s26 = smov 8   ;;  %s663_s22 = int_to_ptr.vmem [resolvable:$true] %s662_s22 }
   0xb   :  { %696 = vmatmul.msk.bf16.vlgmr.msra.gmra.mxu0 %vm50_vm0, %v735_v12 }
   0xc   :  { %697 = vmatmul.msk.bf16.vlgmr.msra.gmra.mxu1 %vm50_vm0, %v735_v12 }
  0x88   :  { %v63_v13 = vpop.f32.mrf.mxu0 }
  0x89   :  { %v77_v14 = vpop.f32.mrf.mxu1 }
  0x8a   :  { %v881_v15 = vpack.c.bf16 %v77_v14, %v63_v13 }
  0x8c   :  { %v91_v16 = vunpack.c.l.b16 %v881_v15  ;;  %v162_v17 = vrot.slane %v881_v15, 4 }
  0x8e   :  { %v92_v18 = vpack.c.b16 %v91_v16, %v91_v16  ;;  %v168_v19 = vsel %vm166_vm1, %v162_v17, 0 }
  0x8f   :  { %177 = vmatpush.bf16.msrb.mxu0 %v168_v19 }
  0x90   :  { %212 = vrot.lane.b32.xlu2 %v92_v18, %s817_s0  ;;  %214 = vrot.lane.b32.xlu1 %v92_v18, %s818_s2  ;;  %v65_v20 = vpop.f32.mrf.mxu0 }
  0x91   :  { %93 = vrot.lane.b32.xlu0 %v92_v18, %s819_s7  ;;  %v79_v21 = vpop.f32.mrf.mxu1 }
  0x92   :  { %v888_v22 = vpack.c.bf16 %v79_v21, %v65_v20 }
  0x94   :  { %v116_v23 = vunpack.c.l.b16 %v888_v22  ;;  %v183_v24 = vrot.slane %v888_v22, 4 }
  0x96   :  { %v117_v25 = vpack.c.b16 %v116_v23, %v116_v23  ;;  %v188_v26 = vsel %vm166_vm1, %v183_v24, 0 }
  0x97   :  { %197 = vmatpush.bf16.msrb.mxu1 %v188_v26 }
  0x98   :  { %235 = vrot.lane.b32.xlu2 %v117_v25, %s817_s0  ;;  %237 = vrot.lane.b32.xlu1 %v117_v25, %s818_s2 }
  0x99   :  { %118 = vrot.lane.b32.xlu0 %v117_v25, %s819_s7 }
  0xa0   :  { %341 = vrot.lane.b32.xlu2 %v92_v18, %s820_s8  ;;  %366 = vrot.lane.b32.xlu1 %v117_v25, %s821_s9 }
  0xa1   :  { %343 = vrot.lane.b32.xlu0 %v92_v18, %s821_s9 }
  0xa8   :  { %495 = vrot.lane.b32.xlu2 %v117_v25, %s822_s10  ;;  %472 = vrot.lane.b32.xlu1 %v92_v18, %s822_s10 }
  0xa9   :  { %364 = vrot.lane.b32.xlu0 %v117_v25, %s820_s8 }
  0xb0   :  { %493 = vrot.lane.b32.xlu1 %v117_v25, %s823_s11 }
  0xb1   :  { %470 = vrot.lane.b32.xlu0 %v92_v18, %s823_s11 }
  0xea   :  { %v213_v28 = vpop.permute.xlu2 %212 }
  0xf2   :  { %v236_v36 = vpop.permute.xlu2 %235 }
  0xfa   :  { %v342_v41 = vpop.permute.xlu2 %341 }
 0x102   :  { %v215_v27 = vpop.permute.xlu1 %214  ;;  %v496_v44 = vpop.permute.xlu2 %495 }
 0x103   :  { %v94_v29 = vpop.permute.xlu0 %93  ;;  %v220_v30 = vsel %vm95_vm2, %v215_v27, 0  ;;  %v501_v45 = vsel %vm95_vm2, %v496_v44, 0 }
 0x104   :  { %v100_v31 = vsel %vm95_vm2, %v94_v29, 0 }
 0x105   :  { %109 = vmatpush.bf16.xpose.msra.mxu2 %v100_v31 }
 0x10a   :  { %v238_v32 = vpop.permute.xlu1 %237 }
 0x10b   :  { %v119_v33 = vpop.permute.xlu0 %118  ;;  %v243_v34 = vsel %vm95_vm2, %v238_v32, 0 }
 0x10c   :  { %698 = vmatmul.msk.bf16.vlgmr.msra.gmra.mxu2 %vm95_vm2, %v881_v15  ;;  %v124_v35 = vsel %vm95_vm2, %v119_v33, 0 }
 0x10d   :  { %229 = vmatpush.bf16.xpose.msrb.mxu2 %v220_v30  ;;  %133 = vmatpush.bf16.xpose.msra.mxu3 %v124_v35 }
 0x112   :  { %v367_v37 = vpop.permute.xlu1 %366 }
 0x113   :  { %v372_v38 = vsel %vm95_vm2, %v367_v37, 0  ;;  %v344_v39 = vpop.permute.xlu0 %343 }
 0x114   :  { %v349_v40 = vsel %vm95_vm2, %v344_v39, 0  ;;  %699 = vmatmul.msk.bf16.vlgmr.msra.gmra.mxu3 %vm95_vm2, %v888_v22 }
 0x115   :  { %252 = vmatpush.bf16.xpose.msrb.mxu3 %v243_v34  ;;  %358 = vmatpush.bf16.xpose.msra.mxu2 %v349_v40 }
 0x11a   :  { %v473_v42 = vpop.permute.xlu1 %472 }
 0x11b   :  { %v478_v43 = vsel %vm95_vm2, %v473_v42, 0  ;;  %v365_v46 = vpop.permute.xlu0 %364 }
 0x11c   :  { %702 = vmatmul.msk.bf16.vlgmr.msrb.gmra.mxu2 %vm95_vm2, %v213_v28 }
 0x11d   :  { %381 = vmatpush.bf16.xpose.msra.mxu3 %v372_v38  ;;  %487 = vmatpush.bf16.xpose.msrb.mxu2 %v478_v43 }
 0x122   :  { %v494_v48 = vpop.permute.xlu1 %493 }
 0x123   :  { %v471_v47 = vpop.permute.xlu0 %470 }
 0x124   :  { %703 = vmatmul.msk.bf16.vlgmr.msrb.gmra.mxu3 %vm95_vm2, %v236_v36 }
 0x125   :  { %510 = vmatpush.bf16.xpose.msrb.mxu3 %v501_v45 }
 0x12c   :  { %706 = vmatmul.msk.bf16.vlgmr.msra.gmra.mxu2 %vm95_vm2, %v342_v41 }
 0x134   :  { %707 = vmatmul.msk.bf16.vlgmr.msra.gmra.mxu3 %vm95_vm2, %v365_v46 }
 0x13c   :  { %710 = vmatmul.msk.bf16.vlgmr.msrb.gmra.mxu2 %vm95_vm2, %v471_v47 }
 0x144   :  { %711 = vmatmul.msk.bf16.vlgmr.msrb.gmra.mxu3 %vm95_vm2, %v494_v48 }
 0x18f   :  { %v111_v52 = vpop.f32.mrf.mxu2 }
 0x190   :  { %v139_v53 = vsel %vm924_vm3, %v111_v52, -1e+08 }
 0x191   :  { %v142_v54 = vsel %vm141_vm4, %v139_v53, -inf }
 0x192   :  { %143 = vmax.xlane.f32.xlu2 %v142_v54 }
 0x197   :  { %v113_v57 = vpop.f32.mrf.mxu2  ;;  %v135_v58 = vpop.f32.mrf.mxu3 }
 0x198   :  { %v140_v59 = vsel %vm931_vm5, %v135_v58, -1e+08 }
 0x199   :  { %v145_v60 = vsel %vm141_vm4, %v140_v59, -inf }
 0x19a   :  { %146 = vmax.xlane.f32.xlu0 %v145_v60 }
 0x19f   :  { %v137_v61 = vpop.f32.mrf.mxu3  ;;  %v231_v62 = vpop.f32.mrf.mxu2 }
 0x1a0   :  { %v258_v63 = vsel %vm924_vm3, %v231_v62, -1e+08 }
 0x1a1   :  { %v260_v0 = vsel %vm141_vm4, %v258_v63, -inf }
 0x1a2   :  { %261 = vmax.xlane.f32.xlu1 %v260_v0 }
 0x1a7   :  { %v233_v1 = vpop.f32.mrf.mxu2  ;;  %v254_v2 = vpop.f32.mrf.mxu3 }
 0x1a8   :  { %v259_v3 = vsel %vm931_vm5, %v254_v2, -1e+08 }
 0x1a9   :  { %v263_v4 = vsel %vm141_vm4, %v259_v3, -inf }
 0x1aa   :  { %264 = vmax.xlane.f32.xlu2 %v263_v4 }
 0x1ae   :  { %302 = vrot.lane.b32.xlu0 %v888_v22, %s817_s0 }
 0x1af   :  { %v256_v5 = vpop.f32.mrf.mxu3  ;;  %v360_v6 = vpop.f32.mrf.mxu2 }
 0x1b0   :  { %v960_v17 = vsel %vm924_vm3, %v360_v6, -1e+08 }
 0x1b1   :  { %v389_v18 = vsel %vm141_vm4, %v960_v17, -inf }
 0x1b6   :  { %431 = vrot.lane.b32.xlu0 %v888_v22, %s820_s8 }
 0x1b7   :  { %v362_v7 = vpop.f32.mrf.mxu2  ;;  %v383_v8 = vpop.f32.mrf.mxu3 }
 0x1b8   :  { %v970_v20 = vsel %vm931_vm5, %v383_v8, -1e+08 }
 0x1b9   :  { %v392_v23 = vsel %vm141_vm4, %v970_v20, -inf }
 0x1bb   :  { %409 = vrot.lane.b32.xlu1 %v881_v15, %s820_s8 }
 0x1bf   :  { %v385_v9 = vpop.f32.mrf.mxu3  ;;  %v489_v10 = vpop.f32.mrf.mxu2 }
 0x1c0   :  { %v966_v19 = vsel %vm924_vm3, %v489_v10, -1e+08 }
 0x1c1   :  { %v518_v21 = vsel %vm141_vm4, %v966_v19, -inf }
 0x1c2   :  { %280 = vrot.lane.b32.xlu2 %v881_v15, %s817_s0 }
 0x1c7   :  { %v491_v11 = vpop.f32.mrf.mxu2  ;;  %v512_v12 = vpop.f32.mrf.mxu3 }
 0x1c8   :  { %v954_v14 = vsel %vm931_vm5, %v512_v12, -1e+08 }
 0x1c9   :  { %v521_v16 = vsel %vm141_vm4, %v954_v14, -inf }
 0x1cf   :  { %v514_v13 = vpop.f32.mrf.mxu3 }
 0x1e0   :  { %522 = vmax.xlane.f32.xlu0 %v521_v16 }
 0x1e5   :  { %390 = vmax.xlane.f32.xlu1 %v389_v18 }
 0x1eb   :  { %519 = vmax.xlane.f32.xlu2 %v518_v21 }
 0x1ed   :  { %393 = vmax.xlane.f32.xlu1 %v392_v23 }
 0x205   :  { %v144_v24 = vpop.xlane.xlu2 %143 }
 0x206   :  { %v148_v25 = vsub.f32 %v139_v53, %v144_v24  ;;  %538 = vrot.lane.b32.xlu1 %v881_v15, %s823_s11 }
 0x208   :  { %v150_v26 = vmul.f32 1.442695, %v148_v25 }
 0x20a   :  { %759 = vpow2.f32 %v150_v26 }
 0x20d   :  { %v147_v27 = vpop.xlane.xlu0 %146 }
 0x20e   :  { %v149_v28 = vsub.f32 %v140_v59, %v147_v27  ;;  %560 = vrot.lane.b32.xlu1 %v888_v22, %s823_s11 }
 0x210   :  { %v760_v29 = vpop.eup %759  ;;  %v152_v30 = vmul.f32 1.442695, %v149_v28 }
 0x211   :  { %v154_v31 = vsel %vm141_vm4, %v760_v29, 0.0  ;;  %v160_v32 = vpack.c.bf16 %v760_v29, %v760_v29 }
 0x212   :  { %761 = vpow2.f32 %v152_v30  ;;  %155 = vadd.xlane.f32.xlu0 %v154_v31 }
 0x213   :  { %700 = vmatmul.msk.bf16.vlgmr.msrb.gmra.mxu0 %vm141_vm4, %v160_v32 }
 0x215   :  { %v262_v33 = vpop.xlane.xlu1 %261 }
 0x216   :  { %v266_v15 = vsub.f32 %v258_v63, %v262_v33 }
 0x218   :  { %v982_v34 = vpop.eup %761  ;;  %v268_v36 = vmul.f32 1.442695, %v266_v15 }
 0x219   :  { %v161_v35 = vpack.c.bf16 %v982_v34, %v982_v34 }
 0x21a   :  { %763 = vpow2.f32 %v268_v36 }
 0x21b   :  { %701 = vmatmul.msk.bf16.vlgmr.msrb.gmra.mxu1 %vm141_vm4, %v161_v35 }
 0x21d   :  { %v265_v22 = vpop.xlane.xlu2 %264 }
 0x21e   :  { %v267_v37 = vsub.f32 %v259_v3, %v265_v22 }
 0x220   :  { %v270_v38 = vmul.f32 1.442695, %v267_v37  ;;  %v303_v39 = vpop.permute.xlu0 %302  ;;  %v764_v44 = vpop.eup %763 }
 0x221   :  { %v304_v40 = vrot.slane %v303_v39, 4  ;;  %v278_v51 = vpack.c.bf16 %v764_v44, %v764_v44  ;;  %v272_v56 = vsel %vm141_vm4, %v764_v44, 0.0 }
 0x222   :  { %765 = vpow2.f32 %v270_v38 }
 0x223   :  { %v309_v41 = vsel %vm166_vm1, %v304_v40, 0 }
 0x224   :  { %318 = vmatpush.bf16.msra.mxu1 %v309_v41 }
 0x225   :  { %v281_v42 = vpop.permute.xlu2 %280 }
 0x226   :  { %v282_v43 = vrot.slane %v281_v42, 4 }
 0x228   :  { %v766_v45 = vpop.eup %765  ;;  %v287_v46 = vsel %vm166_vm1, %v282_v43, 0  ;;  %v432_v47 = vpop.permute.xlu0 %431 }
 0x229   :  { %v279_v48 = vpack.c.bf16 %v766_v45, %v766_v45  ;;  %v433_v49 = vrot.slane %v432_v47, 4  ;;  %296 = vmatpush.bf16.msra.mxu0 %v287_v46  ;;  %v275_v50 = vsel %vm141_vm4, %v766_v45, 0.0 }
 0x22a   :  { %276 = vadd.xlane.f32.xlu2 %v275_v50 }
 0x22b   :  { %v438_v52 = vsel %vm166_vm1, %v433_v49, 0  ;;  %705 = vmatmul.msk.bf16.vlgmr.msra.gmra.mxu1 %vm141_vm4, %v279_v48 }
 0x22c   :  { %704 = vmatmul.msk.bf16.vlgmr.msra.gmra.mxu0 %vm141_vm4, %v278_v51  ;;  %447 = vmatpush.bf16.msrb.mxu1 %v438_v52 }
 0x22d   :  { %v410_v53 = vpop.permute.xlu1 %409 }
 0x22e   :  { %v411_v54 = vrot.slane %v410_v53, 4 }
 0x230   :  { %v416_v55 = vsel %vm166_vm1, %v411_v54, 0 }
 0x231   :  { %425 = vmatpush.bf16.msrb.mxu0 %v416_v55 }
 0x238   :  { %273 = vadd.xlane.f32.xlu1 %v272_v56 }
 0x253   :  { %v523_v62 = vpop.xlane.xlu0 %522 }
 0x254   :  { %v525_v3 = vsub.f32 %v954_v14, %v523_v62 }
 0x256   :  { %v528_v7 = vmul.f32 1.442695, %v525_v3 }
 0x258   :  { %v391_v57 = vpop.xlane.xlu1 %390 }
 0x259   :  { %v395_v58 = vsub.f32 %v960_v17, %v391_v57 }
 0x25b   :  { %v397_v59 = vmul.f32 1.442695, %v395_v58 }
 0x25d   :  { %767 = vpow2.f32 %v397_v59 }
 0x25e   :  { %v520_v60 = vpop.xlane.xlu2 %519 }
 0x25f   :  { %v524_v61 = vsub.f32 %v966_v19, %v520_v60  ;;  %v157_v19 = vsel %vm141_vm4, %v982_v34, 0.0 }
 0x260   :  { %v394_v63 = vpop.xlane.xlu1 %393 }
 0x261   :  { %v526_v0 = vmul.f32 1.442695, %v524_v61  ;;  %v396_v1 = vsub.f32 %v970_v20, %v394_v63 }
 0x263   :  { %v768_v2 = vpop.eup %767  ;;  %769 = vpow2.f32 %v526_v0  ;;  %v399_v4 = vmul.f32 1.442695, %v396_v1 }
 0x264   :  { %v407_v5 = vpack.c.bf16 %v768_v2, %v768_v2  ;;  %v401_v6 = vsel %vm141_vm4, %v768_v2, 0.0 }
 0x265   :  { %771 = vpow2.f32 %v399_v4  ;;  %402 = vadd.xlane.f32.xlu0 %v401_v6 }
 0x266   :  { %708 = vmatmul.msk.bf16.vlgmr.msrb.gmra.mxu0 %vm141_vm4, %v407_v5  ;;  %773 = vpow2.f32 %v528_v7 }
 0x269   :  { %v770_v8 = vpop.eup %769 }
 0x26a   :  { %v530_v12 = vsel %vm141_vm4, %v770_v8, 0.0  ;;  %v536_v20 = vpack.c.bf16 %v770_v8, %v770_v8 }
 0x26b   :  { %v772_v9 = vpop.eup %771 }
 0x26c   :  { %v408_v10 = vpack.c.bf16 %v772_v9, %v772_v9  ;;  %v404_v11 = vsel %vm141_vm4, %v772_v9, 0.0  ;;  %v774_v13 = vpop.eup %773 }
 0x26d   :  { %405 = vadd.xlane.f32.xlu2 %v404_v11  ;;  %531 = vadd.xlane.f32.xlu0 %v530_v12  ;;  %v533_v14 = vsel %vm141_vm4, %v774_v13, 0.0  ;;  %v537_v25 = vpack.c.bf16 %v774_v13, %v774_v13  ;;  %v743_v11 = vld [vmem:[%s1039_s3 + $0x10] sm:$0xff] }
 0x26e   :  { %709 = vmatmul.msk.bf16.vlgmr.msrb.gmra.mxu1 %vm141_vm4, %v408_v10  ;;  %v744_v10 = vld [vmem:[%s1039_s3 + $0x18] sm:$0xff] }
 0x26f   :  { %646 = vmatpush.bf16.msra.mxu2 %v744_v10 }
 0x273   :  { %647 = vmatpush.bf16.msra.mxu2 %v743_v11 }
 0x275   :  { %534 = vadd.xlane.f32.xlu2 %v533_v14  ;;  %v742_v14 = vld [vmem:[%s1039_s3 + $0x8] sm:$0xff] }
 0x277   :  { %648 = vmatpush.bf16.msra.mxu2 %v742_v14 }
 0x278   :  { %v539_v16 = vpop.permute.xlu1 %538 }
 0x279   :  { %v540_v17 = vrot.slane %v539_v16, 4  ;;  %v741_v16 = vld [vmem:[%s1039_s3] sm:$0xff]  ;;  %s825_s3 = smov 128  }
 0x27b   :  { %v545_v18 = vsel %vm166_vm1, %v540_v17, 0  ;;  %649 = vmatpush.bf16.msra.mxu2 %v741_v16 }
 0x27c   :  { %554 = vmatpush.bf16.msra.mxu0 %v545_v18 }
 0x27d   :  { %158 = vadd.xlane.f32.xlu2 %v157_v19 }
 0x27f   :  { %712 = vmatmul.msk.bf16.vlgmr.msra.gmra.mxu0 %vm141_vm4, %v536_v20 }
 0x280   :  { %v561_v21 = vpop.permute.xlu1 %560 }
 0x281   :  { %v562_v23 = vrot.slane %v561_v21, 4 }
 0x283   :  { %v567_v24 = vsel %vm166_vm1, %v562_v23, 0 }
 0x284   :  { %576 = vmatpush.bf16.msra.mxu1 %v567_v24 }
 0x285   :  { %v156_v26 = vpop.xlane.xlu0 %155 }
 0x286   :  { %775 = vrcp.f32 %v156_v26 }
 0x287   :  { %713 = vmatmul.msk.bf16.vlgmr.msra.gmra.mxu1 %vm141_vm4, %v537_v25 }
 0x28c   :  { %v776_v27 = vpop.eup %775 }
 0x290   :  { %v179_v28 = vpop.f32.mrf.mxu0 }
 0x291   :  { %v205_v29 = vmul.f32 %v776_v27, %v179_v28 }
 0x293   :  { %v207_v30 = vpack.c.bf16 %v205_v29, %v205_v29 }
 0x295   :  { %210 = vst.msk [vmem:[#allocation2] sm:$0xf] %vm209_vm6, %v207_v30 }
 0x298   :  { %v181_v31 = vpop.f32.mrf.mxu0  ;;  %v199_v32 = vpop.f32.mrf.mxu1 }
 0x29d   :  { %v277_v33 = vpop.xlane.xlu2 %276 }
 0x29e   :  { %777 = vrcp.f32 %v277_v33 }
 0x2a0   :  { %v201_v34 = vpop.f32.mrf.mxu1 }
 0x2a4   :  { %v778_v15 = vpop.eup %777 }
 0x2a8   :  { %v320_v35 = vpop.f32.mrf.mxu1 }
 0x2a9   :  { %v327_v36 = vmul.f32 %v778_v15, %v320_v35  ;;  %v298_v22 = vpop.f32.mrf.mxu0 }
 0x2ab   :  { %v329_v37 = vpack.c.bf16 %v327_v36, %v327_v36  ;;  %v274_v38 = vpop.xlane.xlu1 %273 }
 0x2ac   :  { %779 = vrcp.f32 %v274_v38 }
 0x2ad   :  { %334 = vrot.lane.b32.xlu2 %v329_v37, %s822_s10 }
 0x2b0   :  { %v322_v39 = vpop.f32.mrf.mxu1 }
 0x2b1   :  { %v300_v40 = vpop.f32.mrf.mxu0 }
 0x2b2   :  { %v780_v41 = vpop.eup %779 }
 0x2b3   :  { %v326_v42 = vmul.f32 %v780_v41, %v298_v22 }
 0x2b5   :  { %v328_v43 = vpack.c.bf16 %v326_v42, %v326_v42 }
 0x2b7   :  { %332 = vrot.lane.b32.xlu0 %v328_v43, %s822_s10 }
 0x2d8   :  { %v403_v44 = vpop.xlane.xlu0 %402 }
 0x2d9   :  { %781 = vrcp.f32 %v403_v44 }
 0x2df   :  { %v782_v46 = vpop.eup %781 }
 0x2e0   :  { %v406_v45 = vpop.xlane.xlu2 %405  ;;  %v532_v57 = vpop.xlane.xlu0 %531 }
 0x2e1   :  { %783 = vrcp.f32 %v406_v45 }
 0x2e3   :  { %v427_v47 = vpop.f32.mrf.mxu0 }
 0x2e4   :  { %v455_v48 = vmul.f32 %v782_v46, %v427_v47 }
 0x2e6   :  { %v457_v49 = vpack.c.bf16 %v455_v48, %v455_v48 }
 0x2e7   :  { %v784_v51 = vpop.eup %783 }
 0x2e8   :  { %v535_v50 = vpop.xlane.xlu2 %534  ;;  %461 = vrot.lane.b32.xlu1 %v457_v49, %s821_s9 }
 0x2eb   :  { %v429_v52 = vpop.f32.mrf.mxu0  ;;  %v449_v53 = vpop.f32.mrf.mxu1 }
 0x2ec   :  { %v456_v54 = vmul.f32 %v784_v51, %v449_v53 }
 0x2ee   :  { %v458_v55 = vpack.c.bf16 %v456_v54, %v456_v54 }
 0x2f0   :  { %463 = vrot.lane.b32.xlu0 %v458_v55, %s821_s9  ;;  %v159_v56 = vpop.xlane.xlu2 %158 }
 0x2f1   :  { %785 = vrcp.f32 %v159_v56 }
 0x2f2   :  { %787 = vrcp.f32 %v532_v57 }
 0x2f3   :  { %v451_v58 = vpop.f32.mrf.mxu1  ;;  %789 = vrcp.f32 %v535_v50 }
 0x2f7   :  { %v786_v59 = vpop.eup %785 }
 0x2f8   :  { %v206_v60 = vmul.f32 %v786_v59, %v199_v32  ;;  %v788_v62 = vpop.eup %787 }
 0x2f9   :  { %v790_v2 = vpop.eup %789 }
 0x2fa   :  { %v208_v61 = vpack.c.bf16 %v206_v60, %v206_v60 }
 0x2fc   :  { %v556_v63 = vpop.f32.mrf.mxu0  ;;  %211 = vst.msk [vmem:[#allocation2 + $0x4] sm:$0xf] %vm209_vm6, %v208_v61 }
 0x2fd   :  { %v584_v0 = vmul.f32 %v788_v62, %v556_v63 }
 0x2ff   :  { %v586_v1 = vpack.c.bf16 %v584_v0, %v584_v0 }
 0x301   :  { %590 = vrot.lane.b32.xlu2 %v586_v1, %s818_s2 }
 0x304   :  { %v558_v3 = vpop.f32.mrf.mxu0  ;;  %v578_v4 = vpop.f32.mrf.mxu1 }
 0x305   :  { %v585_v5 = vmul.f32 %v790_v2, %v578_v4 }
 0x307   :  { %v587_v6 = vpack.c.bf16 %v585_v5, %v585_v5  ;;  %v335_v7 = vpop.permute.xlu2 %334 }
 0x308   :  { %340 = vst.msk [vmem:[#allocation2 + $0x4] sm:$0xf] %vm338_vm7, %v335_v7 }
 0x309   :  { %592 = vrot.lane.b32.xlu0 %v587_v6, %s818_s2 }
 0x30c   :  { %v580_v8 = vpop.f32.mrf.mxu1 }
 0x329   :  { %v333_v9 = vpop.permute.xlu0 %332 }
 0x32a   :  { %339 = vst.msk [vmem:[#allocation2] sm:$0xf] %vm338_vm7, %v333_v9 }
 0x35a   :  { %v462_v12 = vpop.permute.xlu1 %461 }
 0x35b   :  { %468 = vst.msk [vmem:[#allocation2] sm:$0xf] %vm467_vm8, %v462_v12  ;;  %v591_v13 = vpop.permute.xlu2 %590 }
 0x35c   :  { %597 = vst.msk [vmem:[#allocation2] sm:$0xf] %vm596_vm9, %v591_v13 }
 0x362   :  { %v464_v17 = vpop.permute.xlu0 %463 }
 0x363   :  { %469 = vst.msk [vmem:[#allocation2 + $0x4] sm:$0xf] %vm467_vm8, %v464_v17 }
 0x37b   :  { %v593_v18 = vpop.permute.xlu0 %592 }
 0x37c   :  { %598 = vst.msk [vmem:[#allocation2 + $0x4] sm:$0xf] %vm596_vm9, %v593_v18 }
 0x383   :  { %v740_v19 = vld [vmem:[#allocation2] sm:$0xff] }
 0x384   :  { %734 = vmatmul.msk.bf16.vlgmr.msra.gmra.mxu2 %vm638_vm10, %v740_v19 }
 0x407   :  { %v651_v20 = vpop.f32.mrf.mxu2 }
 0x408   :  { %656 = vst.msk [vmem:[#allocation3] sm:$0xff] %vm50_vm0, %v651_v20 }
 0x40f   :  { %v653_v21 = vpop.f32.mrf.mxu2 }
 0x410   :  { %657 = vst.msk [vmem:[#allocation3 + $0x8] sm:$0xff] %vm50_vm0, %v653_v21 }
 0x411   :  { %670 = dma.vmem_to_hbm [thread:$0]  %s663_s22, 256, %s665_s25, [#allocation4], %s825_s3, %s825_s3, %s826_s26  }
 0x412   :  { %815 = dma.done.wait [#allocation4], 256  }
 0x413   :  { %816 = vsyncadd [#allocation4], 4294967040 }
 0x414   :  { %675 = vsyncpa [#allocation4], 1 }

</bundles_post_ra>
